<compile_context>
chip_gen: v5e
topology: v5e:2x2
jax: 0.10.0
libtpu: 0.0.40
codegen_flags: <defaults>
</compile_context>

<pallas_src>
import functools
import numpy as np
import jax
import jax.numpy as jnp
from jax import lax
from jax.experimental import pallas as pl
from jax.experimental.pallas import tpu as pltpu


# ----------------------------------------------------------------------------
# Padding helpers
# ----------------------------------------------------------------------------
def _round_up(x, m):
    return ((x + m - 1) // m) * m


def _pad2(a, rows, cols):
    return jnp.pad(a, ((0, rows - a.shape[0]), (0, cols - a.shape[1])))


def _pad_gate_cols(w, rows_p, H, Hp):
    """Gate-stacked (rows, 4H) -> (rows_p, 4Hp); gate k lands at cols [k*Hp, k*Hp+H)."""
    r = w.shape[0]
    w4 = w.reshape(r, 4, H)
    w4 = jnp.pad(w4, ((0, rows_p - r), (0, 0), (0, Hp - H)))
    return w4.reshape(rows_p, 4 * Hp)


# ----------------------------------------------------------------------------
# Pallas kernel: whole forward in one invocation (no grid).
# ----------------------------------------------------------------------------
def _decoder_kernel(z_ref,                       # (Bp, Lp) bf16
                    w_init_ref, b_init_ref,      # fused fc_hidden|fc_cell|fc_input
                    wih_ref, blstm_ref,          # LSTM input-side (i,f,g,o)
                    whh_ref,                     # LSTM recurrent-side
                    wout_ref, bout_ref,          # fc_output
                    out_ref,                     # (T, Bp, Op) f32 output slab
                    hseq_ref,                    # (T, Bp, Hp) bf16 scratch
                    *, T, Hp, Bp, Op, unroll):
    # --- one-time init: fused projection, then slice (all slices 128-aligned)
    proj = (jnp.dot(z_ref[...], w_init_ref[...],
                    preferred_element_type=jnp.float32) + b_init_ref[...])
    h0 = proj[:, 0 * Hp:1 * Hp]                  # fc_hidden(z)   (f32)
    c0 = proj[:, 1 * Hp:2 * Hp]                  # fc_cell(z)     (f32)
    x = proj[:, 2 * Hp:]                         # fc_input(z), constant over t

    # --- hoisted input-side gate pre-activation (constant across timesteps)
    xg = (jnp.dot(x.astype(jnp.bfloat16), wih_ref[...],
                  preferred_element_type=jnp.float32) + blstm_ref[...])

    whh = whh_ref[...]                           # bf16, resident across loop

    def step(t, carry):
        h, c = carry                             # f32 carries
        gates = (jnp.dot(h.astype(jnp.bfloat16), whh,
                         preferred_element_type=jnp.float32) + xg)
        i_g = jax.nn.sigmoid(gates[:, 0 * Hp:1 * Hp])
        f_g = jax.nn.sigmoid(gates[:, 1 * Hp:2 * Hp])
        g_g = jnp.tanh(gates[:, 2 * Hp:3 * Hp])
        o_g = jax.nn.sigmoid(gates[:, 3 * Hp:4 * Hp])
        c_new = f_g * c + i_g * g_g
        h_new = o_g * jnp.tanh(c_new)
        # Only stash h_t; fc_output is deferred to one big post-loop matmul.
        hseq_ref[t] = h_new.astype(jnp.bfloat16)
        return (h_new, c_new)

    lax.fori_loop(0, T, step, (h0, c0), unroll=unroll)

    # --- deferred fc_output: (T*Bp, Hp) @ (Hp, Op), M = T*Bp rows on the MXU.
    h_all = hseq_ref[...].reshape(T * Bp, Hp)
    out = (jnp.dot(h_all, wout_ref[...],
                   preferred_element_type=jnp.float32) + bout_ref[...])
    out_ref[...] = out.reshape(T, Bp, Op)


# ----------------------------------------------------------------------------
# One-time parameter preparation: pad, fuse, cast to bf16 (weights only).
# ----------------------------------------------------------------------------
def prepare_params(p):
    L, H = p["wh"].shape
    O = p["win"].shape[1]
    Lp = _round_up(L, 128)
    Hp = _round_up(H, 128)
    Op = _round_up(O, 128)

    # Fused init projection: [fc_hidden | fc_cell | fc_input]
    w_init = jnp.concatenate(
        [_pad2(p["wh"], Lp, Hp),
         _pad2(p["wc"], Lp, Hp),
         _pad2(p["win"], Lp, Op)], axis=1).astype(jnp.bfloat16)   # (Lp, 2Hp+Op)
    b_init = jnp.concatenate(
        [_pad2(p["bh"], 1, Hp),
         _pad2(p["bc"], 1, Hp),
         _pad2(p["bin"], 1, Op)], axis=1)                         # (1, 2Hp+Op) f32

    wih = _pad_gate_cols(p["wih"], Op, H, Hp).astype(jnp.bfloat16)   # (Op, 4Hp)
    whh = _pad_gate_cols(p["whh"], Hp, H, Hp).astype(jnp.bfloat16)   # (Hp, 4Hp)
    blstm = _pad_gate_cols(p["blstm"], 1, H, Hp)                     # (1, 4Hp) f32
    wout = _pad2(p["wout"], Hp, Op).astype(jnp.bfloat16)             # (Hp, Op)
    bout = _pad2(p["bout"], 1, Op)                                   # (1, Op) f32

    return {
        "w_init": w_init, "b_init": b_init,
        "wih": wih, "blstm": blstm, "whh": whh,
        "wout": wout, "bout": bout,
        "dims": {"L": L, "H": H, "O": O, "Lp": Lp, "Hp": Hp, "Op": Op},
    }


# ----------------------------------------------------------------------------
# Wrapper: pad activations, run the kernel once, un-pad.
# ----------------------------------------------------------------------------
def decoder_forward(z, prep, seq_length):
    """z: (B, L) float32 -> (B, T, O) float32 (matches the PyTorch forward)."""
    B, L = z.shape
    d = prep["dims"]
    H, O = d["H"], d["O"]
    Lp, Hp, Op = d["Lp"], d["Hp"], d["Op"]
    T = seq_length

    Bp = _round_up(B, 8)                       # sublane alignment
    z_p = _pad2(z, Bp, Lp).astype(jnp.bfloat16)

    unroll = min(T, 8)                         # bounded partial unroll
    kernel = functools.partial(_decoder_kernel, T=T, Hp=Hp, Bp=Bp, Op=Op,
                               unroll=unroll)

    args = (z_p, prep["w_init"], prep["b_init"], prep["wih"], prep["blstm"],
            prep["whh"], prep["wout"], prep["bout"])

    # Size the scoped VMEM limit from the padded operands (+ slab + scratch),
    # with headroom; default limits (16/32 MiB on v5e/v6e) become the first
    # wall when H grows.
    needed = sum(int(np.prod(a.shape)) * a.dtype.itemsize for a in args)
    needed += T * Bp * Op * 4                  # f32 output slab
    needed += T * Bp * Hp * 2                  # bf16 hseq scratch
    vmem_limit = int(min(64 * 2**20, max(2 * needed + (4 << 20), 32 * 2**20)))

    vspec = pl.BlockSpec(memory_space=pltpu.MemorySpace.VMEM)

    out_tbo = pl.pallas_call(
        kernel,
        out_shape=jax.ShapeDtypeStruct((T, Bp, Op), jnp.float32),
        in_specs=[vspec] * len(args),
        out_specs=vspec,
        scratch_shapes=[pltpu.VMEM((T, Bp, Hp), jnp.bfloat16)],
        compiler_params=pltpu.CompilerParams(vmem_limit_bytes=vmem_limit),
    )(*args)

    # (T, Bp, Op) -> (B, T, O)
    return jnp.transpose(out_tbo[:, :B, :O], (1, 0, 2))


# ----------------------------------------------------------------------------
# Deterministic parameter construction (synthetic weights, PyTorch shapes)
# ----------------------------------------------------------------------------
def make_params(key, latent_dim, hidden_size, output_size):
    ks = jax.random.split(key, 12)
    u = lambda k, shape, s: jax.random.uniform(k, shape, jnp.float32, -s, s)
    H, L, O = hidden_size, latent_dim, output_size
    return {
        # Linear weights stored transposed: (in, out)
        "wh":    u(ks[0], (L, H), 0.3),
        "bh":    u(ks[1], (1, H), 0.3),
        "wc":    u(ks[2], (L, H), 0.3),
        "bc":    u(ks[3], (1, H), 0.3),
        "win":   u(ks[4], (L, O), 0.3),
        "bin":   u(ks[5], (1, O), 0.3),
        # LSTM: PyTorch gate order (i, f, g, o) concatenated along 4H
        "wih":   u(ks[6], (O, 4 * H), 0.3),
        "whh":   u(ks[7], (H, 4 * H), 0.3),
        "blstm": u(ks[8], (1, 4 * H), 0.3),   # b_ih + b_hh folded together
        "wout":  u(ks[9], (H, O), 0.3),
        "bout":  u(ks[10], (1, O), 0.3),
    }


# ----------------------------------------------------------------------------
# Pure-JAX reference (mirrors the PyTorch forward).  bf16_weights=True mirrors
# the kernel's mixed precision (bf16 matmul operands, f32 accumulation and
# f32 elementwise) for a tight correctness check.
# ----------------------------------------------------------------------------
def decoder_ref(z, p, seq_length, bf16_weights=False):
    H = p["wh"].shape[1]
    if bf16_weights:
        dot = lambda a, b: jnp.dot(a.astype(jnp.bfloat16), b.astype(jnp.bfloat16),
                                   preferred_element_type=jnp.float32)
    else:
        dot = lambda a, b: jnp.dot(a, b, preferred_element_type=jnp.float32)

    h = dot(z, p["wh"]) + p["bh"]
    c = dot(z, p["wc"]) + p["bc"]
    x = dot(z, p["win"]) + p["bin"]      # same input every step
    xg = dot(x, p["wih"]) + p["blstm"]   # constant over time

    def step(carry, _):
        h, c = carry
        g = dot(h, p["whh"]) + xg
        i = jax.nn.sigmoid(g[:, 0 * H:1 * H])
        f = jax.nn.sigmoid(g[:, 1 * H:2 * H])
        gg = jnp.tanh(g[:, 2 * H:3 * H])
        o = jax.nn.sigmoid(g[:, 3 * H:4 * H])
        c = f * c + i * gg
        h = o * jnp.tanh(c)
        return (h, c), dot(h, p["wout"]) + p["bout"]

    _, ys = lax.scan(step, (h, c), None, length=seq_length)  # (T, B, O)
    return jnp.transpose(ys, (1, 0, 2))


if __name__ == "__main__":
    # Small, module-consistent shapes.
    batch_size  = 4
    latent_dim  = 8
    hidden_size = 16
    output_size = 4
    seq_length  = 6
    num_layers  = 1
    assert num_layers == 1   # see TODO(synk) at top

    key = jax.random.PRNGKey(0)
    kz, kp = jax.random.split(key)
    z = jax.random.normal(kz, (batch_size, latent_dim), jnp.float32)
    params = make_params(kp, latent_dim, hidden_size, output_size)

    # Pad / fuse / cast weights once (not per forward call).
    prep = prepare_params(params)

    out = decoder_forward(z, prep, seq_length)
    out = jax.block_until_ready(out)
    assert out.shape == (batch_size, seq_length, output_size)

    # Tight check against a reference mirroring the kernel's mixed precision.
    ref_bf16 = jax.block_until_ready(decoder_ref(z, params, seq_length,
                                                 bf16_weights=True))
    assert np.allclose(np.asarray(out), np.asarray(ref_bf16),
                       atol=1e-2, rtol=1e-2)

    # Looser check against the full-f32 reference (bf16 weight rounding only).
    ref_f32 = jax.block_until_ready(decoder_ref(z, params, seq_length,
                                                bf16_weights=False))
    assert np.allclose(np.asarray(out), np.asarray(ref_f32),
                       atol=7e-2, rtol=7e-2)

    print("KERNEL_OK")
</pallas_src>

<mosaic_0001>
module attributes {stable_mosaic.version = 11 : i64} {
  func.func @_decoder_kernel(%arg0: memref<8x128xbf16, #tpu.memory_space<vmem>>, %arg1: memref<128x384xbf16, #tpu.memory_space<vmem>>, %arg2: memref<1x384xf32, #tpu.memory_space<vmem>>, %arg3: memref<128x512xbf16, #tpu.memory_space<vmem>>, %arg4: memref<1x512xf32, #tpu.memory_space<vmem>>, %arg5: memref<128x512xbf16, #tpu.memory_space<vmem>>, %arg6: memref<128x128xbf16, #tpu.memory_space<vmem>>, %arg7: memref<1x128xf32, #tpu.memory_space<vmem>>, %arg8: memref<6x8x128xf32, #tpu.memory_space<vmem>>, %arg9: memref<6x8x128xbf16, #tpu.memory_space<vmem>>) attributes {dimension_semantics = [], scalar_prefetch = 0 : i64, scratch_operands = 1 : i64, tpu.core_type = #tpu.core_type<tc>} {
    %c0 = arith.constant 0 : index
    %c0_0 = arith.constant 0 : index
    %0 = vector.load %arg0[%c0, %c0_0] : memref<8x128xbf16, #tpu.memory_space<vmem>>, vector<8x128xbf16>
    %c0_1 = arith.constant 0 : index
    %c0_2 = arith.constant 0 : index
    %1 = vector.load %arg1[%c0_1, %c0_2] : memref<128x384xbf16, #tpu.memory_space<vmem>>, vector<128x384xbf16>
    %cst = arith.constant dense<0.000000e+00> : vector<8x384xf32>
    %2 = tpu.matmul %0, %1, %cst {dimension_numbers = #tpu.dot_dimension_numbers<[1], [0], [0], [1], [0, 0, 1, 1], [], []>} : vector<8x128xbf16>, vector<128x384xbf16>, vector<8x384xf32> -> vector<8x384xf32>
    %c0_3 = arith.constant 0 : index
    %c0_4 = arith.constant 0 : index
    %3 = vector.load %arg2[%c0_3, %c0_4] : memref<1x384xf32, #tpu.memory_space<vmem>>, vector<1x384xf32>
    %4 = vector.broadcast %3 : vector<1x384xf32> to vector<8x384xf32>
    %5 = arith.addf %2, %4 : vector<8x384xf32>
    %6 = vector.extract_strided_slice %5 {offsets = [0, 0], sizes = [8, 128], strides = [1, 1]} : vector<8x384xf32> to vector<8x128xf32>
    %7 = vector.extract_strided_slice %5 {offsets = [0, 128], sizes = [8, 128], strides = [1, 1]} : vector<8x384xf32> to vector<8x128xf32>
    %8 = vector.extract_strided_slice %5 {offsets = [0, 256], sizes = [8, 128], strides = [1, 1]} : vector<8x384xf32> to vector<8x128xf32>
    %9 = arith.truncf %8 : vector<8x128xf32> to vector<8x128xbf16>
    %c0_5 = arith.constant 0 : index
    %c0_6 = arith.constant 0 : index
    %10 = vector.load %arg3[%c0_5, %c0_6] : memref<128x512xbf16, #tpu.memory_space<vmem>>, vector<128x512xbf16>
    %cst_7 = arith.constant dense<0.000000e+00> : vector<8x512xf32>
    %11 = tpu.matmul %9, %10, %cst_7 {dimension_numbers = #tpu.dot_dimension_numbers<[1], [0], [0], [1], [0, 0, 1, 1], [], []>} : vector<8x128xbf16>, vector<128x512xbf16>, vector<8x512xf32> -> vector<8x512xf32>
    %c0_8 = arith.constant 0 : index
    %c0_9 = arith.constant 0 : index
    %12 = vector.load %arg4[%c0_8, %c0_9] : memref<1x512xf32, #tpu.memory_space<vmem>>, vector<1x512xf32>
    %13 = vector.broadcast %12 : vector<1x512xf32> to vector<8x512xf32>
    %14 = arith.addf %11, %13 : vector<8x512xf32>
    %c0_10 = arith.constant 0 : index
    %c0_11 = arith.constant 0 : index
    %15 = vector.load %arg5[%c0_10, %c0_11] : memref<128x512xbf16, #tpu.memory_space<vmem>>, vector<128x512xbf16>
    %c0_i32 = arith.constant 0 : i32
    %16 = arith.truncf %6 : vector<8x128xf32> to vector<8x128xbf16>
    %cst_12 = arith.constant dense<0.000000e+00> : vector<8x512xf32>
    %17 = tpu.matmul %16, %15, %cst_12 {dimension_numbers = #tpu.dot_dimension_numbers<[1], [0], [0], [1], [0, 0, 1, 1], [], []>} : vector<8x128xbf16>, vector<128x512xbf16>, vector<8x512xf32> -> vector<8x512xf32>
    %18 = arith.addf %17, %14 : vector<8x512xf32>
    %19 = vector.extract_strided_slice %18 {offsets = [0, 0], sizes = [8, 128], strides = [1, 1]} : vector<8x512xf32> to vector<8x128xf32>
    %20 = arith.negf %19 : vector<8x128xf32>
    %21 = math.exp %20 : vector<8x128xf32>
    %cst_13 = arith.constant 1.000000e+00 : f32
    %22 = vector.broadcast %cst_13 : f32 to vector<8x128xf32>
    %23 = arith.addf %22, %21 : vector<8x128xf32>
    %24 = arith.divf %22, %23 : vector<8x128xf32>
    %25 = vector.extract_strided_slice %18 {offsets = [0, 128], sizes = [8, 128], strides = [1, 1]} : vector<8x512xf32> to vector<8x128xf32>
    %26 = arith.negf %25 : vector<8x128xf32>
    %27 = math.exp %26 : vector<8x128xf32>
    %cst_14 = arith.constant 1.000000e+00 : f32
    %28 = vector.broadcast %cst_14 : f32 to vector<8x128xf32>
    %29 = arith.addf %28, %27 : vector<8x128xf32>
    %30 = arith.divf %28, %29 : vector<8x128xf32>
    %31 = vector.extract_strided_slice %18 {offsets = [0, 256], sizes = [8, 128], strides = [1, 1]} : vector<8x512xf32> to vector<8x128xf32>
    %32 = math.tanh %31 : vector<8x128xf32>
    %33 = vector.extract_strided_slice %18 {offsets = [0, 384], sizes = [8, 128], strides = [1, 1]} : vector<8x512xf32> to vector<8x128xf32>
    %34 = arith.negf %33 : vector<8x128xf32>
    %35 = math.exp %34 : vector<8x128xf32>
    %cst_15 = arith.constant 1.000000e+00 : f32
    %36 = vector.broadcast %cst_15 : f32 to vector<8x128xf32>
    %37 = arith.addf %36, %35 : vector<8x128xf32>
    %38 = arith.divf %36, %37 : vector<8x128xf32>
    %39 = arith.mulf %30, %7 : vector<8x128xf32>
    %40 = arith.mulf %24, %32 : vector<8x128xf32>
    %41 = arith.addf %39, %40 : vector<8x128xf32>
    %42 = math.tanh %41 : vector<8x128xf32>
    %43 = arith.mulf %38, %42 : vector<8x128xf32>
    %44 = arith.truncf %43 : vector<8x128xf32> to vector<8x128xbf16>
    %45 = arith.index_cast %c0_i32 : i32 to index
    %c0_16 = arith.constant 0 : index
    %c0_17 = arith.constant 0 : index
    %46 = vector.load %arg9[%45, %c0_16, %c0_17] : memref<6x8x128xbf16, #tpu.memory_space<vmem>>, vector<1x8x128xbf16>
    %47 = vector.shape_cast %46 : vector<1x8x128xbf16> to vector<8x128xbf16>
    %48 = vector.shape_cast %44 : vector<8x128xbf16> to vector<1x8x128xbf16>
    tpu.vector_store %arg9[%45, %c0_16, %c0_17], %48 {strides = array<i32>} : memref<6x8x128xbf16, #tpu.memory_space<vmem>>, vector<1x8x128xbf16>,
    %c1_i32 = arith.constant 1 : i32
    %49 = arith.truncf %43 : vector<8x128xf32> to vector<8x128xbf16>
    %cst_18 = arith.constant dense<0.000000e+00> : vector<8x512xf32>
    %50 = tpu.matmul %49, %15, %cst_18 {dimension_numbers = #tpu.dot_dimension_numbers<[1], [0], [0], [1], [0, 0, 1, 1], [], []>} : vector<8x128xbf16>, vector<128x512xbf16>, vector<8x512xf32> -> vector<8x512xf32>
    %51 = arith.addf %50, %14 : vector<8x512xf32>
    %52 = vector.extract_strided_slice %51 {offsets = [0, 0], sizes = [8, 128], strides = [1, 1]} : vector<8x512xf32> to vector<8x128xf32>
    %53 = arith.negf %52 : vector<8x128xf32>
    %54 = math.exp %53 : vector<8x128xf32>
    %cst_19 = arith.constant 1.000000e+00 : f32
    %55 = vector.broadcast %cst_19 : f32 to vector<8x128xf32>
    %56 = arith.addf %55, %54 : vector<8x128xf32>
    %57 = arith.divf %55, %56 : vector<8x128xf32>
    %58 = vector.extract_strided_slice %51 {offsets = [0, 128], sizes = [8, 128], strides = [1, 1]} : vector<8x512xf32> to vector<8x128xf32>
    %59 = arith.negf %58 : vector<8x128xf32>
    %60 = math.exp %59 : vector<8x128xf32>
    %cst_20 = arith.constant 1.000000e+00 : f32
    %61 = vector.broadcast %cst_20 : f32 to vector<8x128xf32>
    %62 = arith.addf %61, %60 : vector<8x128xf32>
    %63 = arith.divf %61, %62 : vector<8x128xf32>
    %64 = vector.extract_strided_slice %51 {offsets = [0, 256], sizes = [8, 128], strides = [1, 1]} : vector<8x512xf32> to vector<8x128xf32>
    %65 = math.tanh %64 : vector<8x128xf32>
    %66 = vector.extract_strided_slice %51 {offsets = [0, 384], sizes = [8, 128], strides = [1, 1]} : vector<8x512xf32> to vector<8x128xf32>
    %67 = arith.negf %66 : vector<8x128xf32>
    %68 = math.exp %67 : vector<8x128xf32>
    %cst_21 = arith.constant 1.000000e+00 : f32
    %69 = vector.broadcast %cst_21 : f32 to vector<8x128xf32>
    %70 = arith.addf %69, %68 : vector<8x128xf32>
    %71 = arith.divf %69, %70 : vector<8x128xf32>
    %72 = arith.mulf %63, %41 : vector<8x128xf32>
    %73 = arith.mulf %57, %65 : vector<8x128xf32>
    %74 = arith.addf %72, %73 : vector<8x128xf32>
    %75 = math.tanh %74 : vector<8x128xf32>
    %76 = arith.mulf %71, %75 : vector<8x128xf32>
    %77 = arith.truncf %76 : vector<8x128xf32> to vector<8x128xbf16>
    %78 = arith.index_cast %c1_i32 : i32 to index
    %c0_22 = arith.constant 0 : index
    %c0_23 = arith.constant 0 : index
    %79 = vector.load %arg9[%78, %c0_22, %c0_23] : memref<6x8x128xbf16, #tpu.memory_space<vmem>>, vector<1x8x128xbf16>
    %80 = vector.shape_cast %79 : vector<1x8x128xbf16> to vector<8x128xbf16>
    %81 = vector.shape_cast %77 : vector<8x128xbf16> to vector<1x8x128xbf16>
    tpu.vector_store %arg9[%78, %c0_22, %c0_23], %81 {strides = array<i32>} : memref<6x8x128xbf16, #tpu.memory_space<vmem>>, vector<1x8x128xbf16>,
    %c2_i32 = arith.constant 2 : i32
    %82 = arith.truncf %76 : vector<8x128xf32> to vector<8x128xbf16>
    %cst_24 = arith.constant dense<0.000000e+00> : vector<8x512xf32>
    %83 = tpu.matmul %82, %15, %cst_24 {dimension_numbers = #tpu.dot_dimension_numbers<[1], [0], [0], [1], [0, 0, 1, 1], [], []>} : vector<8x128xbf16>, vector<128x512xbf16>, vector<8x512xf32> -> vector<8x512xf32>
    %84 = arith.addf %83, %14 : vector<8x512xf32>
    %85 = vector.extract_strided_slice %84 {offsets = [0, 0], sizes = [8, 128], strides = [1, 1]} : vector<8x512xf32> to vector<8x128xf32>
    %86 = arith.negf %85 : vector<8x128xf32>
    %87 = math.exp %86 : vector<8x128xf32>
    %cst_25 = arith.constant 1.000000e+00 : f32
    %88 = vector.broadcast %cst_25 : f32 to vector<8x128xf32>
    %89 = arith.addf %88, %87 : vector<8x128xf32>
    %90 = arith.divf %88, %89 : vector<8x128xf32>
    %91 = vector.extract_strided_slice %84 {offsets = [0, 128], sizes = [8, 128], strides = [1, 1]} : vector<8x512xf32> to vector<8x128xf32>
    %92 = arith.negf %91 : vector<8x128xf32>
    %93 = math.exp %92 : vector<8x128xf32>
    %cst_26 = arith.constant 1.000000e+00 : f32
    %94 = vector.broadcast %cst_26 : f32 to vector<8x128xf32>
    %95 = arith.addf %94, %93 : vector<8x128xf32>
    %96 = arith.divf %94, %95 : vector<8x128xf32>
    %97 = vector.extract_strided_slice %84 {offsets = [0, 256], sizes = [8, 128], strides = [1, 1]} : vector<8x512xf32> to vector<8x128xf32>
    %98 = math.tanh %97 : vector<8x128xf32>
    %99 = vector.extract_strided_slice %84 {offsets = [0, 384], sizes = [8, 128], strides = [1, 1]} : vector<8x512xf32> to vector<8x128xf32>
    %100 = arith.negf %99 : vector<8x128xf32>
    %101 = math.exp %100 : vector<8x128xf32>
    %cst_27 = arith.constant 1.000000e+00 : f32
    %102 = vector.broadcast %cst_27 : f32 to vector<8x128xf32>
    %103 = arith.addf %102, %101 : vector<8x128xf32>
    %104 = arith.divf %102, %103 : vector<8x128xf32>
    %105 = arith.mulf %96, %74 : vector<8x128xf32>
    %106 = arith.mulf %90, %98 : vector<8x128xf32>
    %107 = arith.addf %105, %106 : vector<8x128xf32>
    %108 = math.tanh %107 : vector<8x128xf32>
    %109 = arith.mulf %104, %108 : vector<8x128xf32>
    %110 = arith.truncf %109 : vector<8x128xf32> to vector<8x128xbf16>
    %111 = arith.index_cast %c2_i32 : i32 to index
    %c0_28 = arith.constant 0 : index
    %c0_29 = arith.constant 0 : index
    %112 = vector.load %arg9[%111, %c0_28, %c0_29] : memref<6x8x128xbf16, #tpu.memory_space<vmem>>, vector<1x8x128xbf16>
    %113 = vector.shape_cast %112 : vector<1x8x128xbf16> to vector<8x128xbf16>
    %114 = vector.shape_cast %110 : vector<8x128xbf16> to vector<1x8x128xbf16>
    tpu.vector_store %arg9[%111, %c0_28, %c0_29], %114 {strides = array<i32>} : memref<6x8x128xbf16, #tpu.memory_space<vmem>>, vector<1x8x128xbf16>,
    %c3_i32 = arith.constant 3 : i32
    %115 = arith.truncf %109 : vector<8x128xf32> to vector<8x128xbf16>
    %cst_30 = arith.constant dense<0.000000e+00> : vector<8x512xf32>
    %116 = tpu.matmul %115, %15, %cst_30 {dimension_numbers = #tpu.dot_dimension_numbers<[1], [0], [0], [1], [0, 0, 1, 1], [], []>} : vector<8x128xbf16>, vector<128x512xbf16>, vector<8x512xf32> -> vector<8x512xf32>
    %117 = arith.addf %116, %14 : vector<8x512xf32>
    %118 = vector.extract_strided_slice %117 {offsets = [0, 0], sizes = [8, 128], strides = [1, 1]} : vector<8x512xf32> to vector<8x128xf32>
    %119 = arith.negf %118 : vector<8x128xf32>
    %120 = math.exp %119 : vector<8x128xf32>
    %cst_31 = arith.constant 1.000000e+00 : f32
    %121 = vector.broadcast %cst_31 : f32 to vector<8x128xf32>
    %122 = arith.addf %121, %120 : vector<8x128xf32>
    %123 = arith.divf %121, %122 : vector<8x128xf32>
    %124 = vector.extract_strided_slice %117 {offsets = [0, 128], sizes = [8, 128], strides = [1, 1]} : vector<8x512xf32> to vector<8x128xf32>
    %125 = arith.negf %124 : vector<8x128xf32>
    %126 = math.exp %125 : vector<8x128xf32>
    %cst_32 = arith.constant 1.000000e+00 : f32
    %127 = vector.broadcast %cst_32 : f32 to vector<8x128xf32>
    %128 = arith.addf %127, %126 : vector<8x128xf32>
    %129 = arith.divf %127, %128 : vector<8x128xf32>
    %130 = vector.extract_strided_slice %117 {offsets = [0, 256], sizes = [8, 128], strides = [1, 1]} : vector<8x512xf32> to vector<8x128xf32>
    %131 = math.tanh %130 : vector<8x128xf32>
    %132 = vector.extract_strided_slice %117 {offsets = [0, 384], sizes = [8, 128], strides = [1, 1]} : vector<8x512xf32> to vector<8x128xf32>
    %133 = arith.negf %132 : vector<8x128xf32>
    %134 = math.exp %133 : vector<8x128xf32>
    %cst_33 = arith.constant 1.000000e+00 : f32
    %135 = vector.broadcast %cst_33 : f32 to vector<8x128xf32>
    %136 = arith.addf %135, %134 : vector<8x128xf32>
    %137 = arith.divf %135, %136 : vector<8x128xf32>
    %138 = arith.mulf %129, %107 : vector<8x128xf32>
    %139 = arith.mulf %123, %131 : vector<8x128xf32>
    %140 = arith.addf %138, %139 : vector<8x128xf32>
    %141 = math.tanh %140 : vector<8x128xf32>
    %142 = arith.mulf %137, %141 : vector<8x128xf32>
    %143 = arith.truncf %142 : vector<8x128xf32> to vector<8x128xbf16>
    %144 = arith.index_cast %c3_i32 : i32 to index
    %c0_34 = arith.constant 0 : index
    %c0_35 = arith.constant 0 : index
    %145 = vector.load %arg9[%144, %c0_34, %c0_35] : memref<6x8x128xbf16, #tpu.memory_space<vmem>>, vector<1x8x128xbf16>
    %146 = vector.shape_cast %145 : vector<1x8x128xbf16> to vector<8x128xbf16>
    %147 = vector.shape_cast %143 : vector<8x128xbf16> to vector<1x8x128xbf16>
    tpu.vector_store %arg9[%144, %c0_34, %c0_35], %147 {strides = array<i32>} : memref<6x8x128xbf16, #tpu.memory_space<vmem>>, vector<1x8x128xbf16>,
    %c4_i32 = arith.constant 4 : i32
    %148 = arith.truncf %142 : vector<8x128xf32> to vector<8x128xbf16>
    %cst_36 = arith.constant dense<0.000000e+00> : vector<8x512xf32>
    %149 = tpu.matmul %148, %15, %cst_36 {dimension_numbers = #tpu.dot_dimension_numbers<[1], [0], [0], [1], [0, 0, 1, 1], [], []>} : vector<8x128xbf16>, vector<128x512xbf16>, vector<8x512xf32> -> vector<8x512xf32>
    %150 = arith.addf %149, %14 : vector<8x512xf32>
    %151 = vector.extract_strided_slice %150 {offsets = [0, 0], sizes = [8, 128], strides = [1, 1]} : vector<8x512xf32> to vector<8x128xf32>
    %152 = arith.negf %151 : vector<8x128xf32>
    %153 = math.exp %152 : vector<8x128xf32>
    %cst_37 = arith.constant 1.000000e+00 : f32
    %154 = vector.broadcast %cst_37 : f32 to vector<8x128xf32>
    %155 = arith.addf %154, %153 : vector<8x128xf32>
    %156 = arith.divf %154, %155 : vector<8x128xf32>
    %157 = vector.extract_strided_slice %150 {offsets = [0, 128], sizes = [8, 128], strides = [1, 1]} : vector<8x512xf32> to vector<8x128xf32>
    %158 = arith.negf %157 : vector<8x128xf32>
    %159 = math.exp %158 : vector<8x128xf32>
    %cst_38 = arith.constant 1.000000e+00 : f32
    %160 = vector.broadcast %cst_38 : f32 to vector<8x128xf32>
    %161 = arith.addf %160, %159 : vector<8x128xf32>
    %162 = arith.divf %160, %161 : vector<8x128xf32>
    %163 = vector.extract_strided_slice %150 {offsets = [0, 256], sizes = [8, 128], strides = [1, 1]} : vector<8x512xf32> to vector<8x128xf32>
    %164 = math.tanh %163 : vector<8x128xf32>
    %165 = vector.extract_strided_slice %150 {offsets = [0, 384], sizes = [8, 128], strides = [1, 1]} : vector<8x512xf32> to vector<8x128xf32>
    %166 = arith.negf %165 : vector<8x128xf32>
    %167 = math.exp %166 : vector<8x128xf32>
    %cst_39 = arith.constant 1.000000e+00 : f32
    %168 = vector.broadcast %cst_39 : f32 to vector<8x128xf32>
    %169 = arith.addf %168, %167 : vector<8x128xf32>
    %170 = arith.divf %168, %169 : vector<8x128xf32>
    %171 = arith.mulf %162, %140 : vector<8x128xf32>
    %172 = arith.mulf %156, %164 : vector<8x128xf32>
    %173 = arith.addf %171, %172 : vector<8x128xf32>
    %174 = math.tanh %173 : vector<8x128xf32>
    %175 = arith.mulf %170, %174 : vector<8x128xf32>
    %176 = arith.truncf %175 : vector<8x128xf32> to vector<8x128xbf16>
    %177 = arith.index_cast %c4_i32 : i32 to index
    %c0_40 = arith.constant 0 : index
    %c0_41 = arith.constant 0 : index
    %178 = vector.load %arg9[%177, %c0_40, %c0_41] : memref<6x8x128xbf16, #tpu.memory_space<vmem>>, vector<1x8x128xbf16>
    %179 = vector.shape_cast %178 : vector<1x8x128xbf16> to vector<8x128xbf16>
    %180 = vector.shape_cast %176 : vector<8x128xbf16> to vector<1x8x128xbf16>
    tpu.vector_store %arg9[%177, %c0_40, %c0_41], %180 {strides = array<i32>} : memref<6x8x128xbf16, #tpu.memory_space<vmem>>, vector<1x8x128xbf16>,
    %c5_i32 = arith.constant 5 : i32
    %181 = arith.truncf %175 : vector<8x128xf32> to vector<8x128xbf16>
    %cst_42 = arith.constant dense<0.000000e+00> : vector<8x512xf32>
    %182 = tpu.matmul %181, %15, %cst_42 {dimension_numbers = #tpu.dot_dimension_numbers<[1], [0], [0], [1], [0, 0, 1, 1], [], []>} : vector<8x128xbf16>, vector<128x512xbf16>, vector<8x512xf32> -> vector<8x512xf32>
    %183 = arith.addf %182, %14 : vector<8x512xf32>
    %184 = vector.extract_strided_slice %183 {offsets = [0, 0], sizes = [8, 128], strides = [1, 1]} : vector<8x512xf32> to vector<8x128xf32>
    %185 = arith.negf %184 : vector<8x128xf32>
    %186 = math.exp %185 : vector<8x128xf32>
    %cst_43 = arith.constant 1.000000e+00 : f32
    %187 = vector.broadcast %cst_43 : f32 to vector<8x128xf32>
    %188 = arith.addf %187, %186 : vector<8x128xf32>
    %189 = arith.divf %187, %188 : vector<8x128xf32>
    %190 = vector.extract_strided_slice %183 {offsets = [0, 128], sizes = [8, 128], strides = [1, 1]} : vector<8x512xf32> to vector<8x128xf32>
    %191 = arith.negf %190 : vector<8x128xf32>
    %192 = math.exp %191 : vector<8x128xf32>
    %cst_44 = arith.constant 1.000000e+00 : f32
    %193 = vector.broadcast %cst_44 : f32 to vector<8x128xf32>
    %194 = arith.addf %193, %192 : vector<8x128xf32>
    %195 = arith.divf %193, %194 : vector<8x128xf32>
    %196 = vector.extract_strided_slice %183 {offsets = [0, 256], sizes = [8, 128], strides = [1, 1]} : vector<8x512xf32> to vector<8x128xf32>
    %197 = math.tanh %196 : vector<8x128xf32>
    %198 = vector.extract_strided_slice %183 {offsets = [0, 384], sizes = [8, 128], strides = [1, 1]} : vector<8x512xf32> to vector<8x128xf32>
    %199 = arith.negf %198 : vector<8x128xf32>
    %200 = math.exp %199 : vector<8x128xf32>
    %cst_45 = arith.constant 1.000000e+00 : f32
    %201 = vector.broadcast %cst_45 : f32 to vector<8x128xf32>
    %202 = arith.addf %201, %200 : vector<8x128xf32>
    %203 = arith.divf %201, %202 : vector<8x128xf32>
    %204 = arith.mulf %195, %173 : vector<8x128xf32>
    %205 = arith.mulf %189, %197 : vector<8x128xf32>
    %206 = arith.addf %204, %205 : vector<8x128xf32>
    %207 = math.tanh %206 : vector<8x128xf32>
    %208 = arith.mulf %203, %207 : vector<8x128xf32>
    %209 = arith.truncf %208 : vector<8x128xf32> to vector<8x128xbf16>
    %210 = arith.index_cast %c5_i32 : i32 to index
    %c0_46 = arith.constant 0 : index
    %c0_47 = arith.constant 0 : index
    %211 = vector.load %arg9[%210, %c0_46, %c0_47] : memref<6x8x128xbf16, #tpu.memory_space<vmem>>, vector<1x8x128xbf16>
    %212 = vector.shape_cast %211 : vector<1x8x128xbf16> to vector<8x128xbf16>
    %213 = vector.shape_cast %209 : vector<8x128xbf16> to vector<1x8x128xbf16>
    tpu.vector_store %arg9[%210, %c0_46, %c0_47], %213 {strides = array<i32>} : memref<6x8x128xbf16, #tpu.memory_space<vmem>>, vector<1x8x128xbf16>,
    %c6_i32 = arith.constant 6 : i32
    %c0_48 = arith.constant 0 : index
    %c0_49 = arith.constant 0 : index
    %c0_50 = arith.constant 0 : index
    %214 = vector.load %arg9[%c0_48, %c0_49, %c0_50] : memref<6x8x128xbf16, #tpu.memory_space<vmem>>, vector<6x8x128xbf16>
    %215 = vector.shape_cast %214 : vector<6x8x128xbf16> to vector<48x128xbf16>
    %c0_51 = arith.constant 0 : index
    %c0_52 = arith.constant 0 : index
    %216 = vector.load %arg6[%c0_51, %c0_52] : memref<128x128xbf16, #tpu.memory_space<vmem>>, vector<128x128xbf16>
    %cst_53 = arith.constant dense<0.000000e+00> : vector<48x128xf32>
    %217 = tpu.matmul %215, %216, %cst_53 {dimension_numbers = #tpu.dot_dimension_numbers<[1], [0], [0], [1], [0, 0, 1, 1], [], []>} : vector<48x128xbf16>, vector<128x128xbf16>, vector<48x128xf32> -> vector<48x128xf32>
    %c0_54 = arith.constant 0 : index
    %c0_55 = arith.constant 0 : index
    %218 = vector.load %arg7[%c0_54, %c0_55] : memref<1x128xf32, #tpu.memory_space<vmem>>, vector<1x128xf32>
    %219 = vector.broadcast %218 : vector<1x128xf32> to vector<48x128xf32>
    %220 = arith.addf %217, %219 : vector<48x128xf32>
    %221 = vector.shape_cast %220 : vector<48x128xf32> to vector<6x8x128xf32>
    %c0_56 = arith.constant 0 : index
    %c0_57 = arith.constant 0 : index
    %c0_58 = arith.constant 0 : index
    %222 = vector.load %arg8[%c0_56, %c0_57, %c0_58] : memref<6x8x128xf32, #tpu.memory_space<vmem>>, vector<6x8x128xf32>
    tpu.vector_store %arg8[%c0_56, %c0_57, %c0_58], %221 {strides = array<i32>} : memref<6x8x128xf32, #tpu.memory_space<vmem>>, vector<6x8x128xf32>,
    return
  }
}

</mosaic_0001>

<bundles_post_ra>
// kernel: tpu_custom_call.1
= control target key start
LH: loop header
LB: loop body
LE: loop exit
PB: predicated region body
PF: predicated region fallthrough
CT: control target
= control target key end

     0   :  { %13 = vsyncpa [#allocation4], 0  ;;  %s2891_s0 = inlined_call_operand.hbm [shape: bf16[8,128], index: 0, kind: input, shape index: {}]   ;;  %s2892_s1 = inlined_call_operand.hbm [shape: bf16[128,384], index: 1, kind: input, shape index: {}]   ;;  %s2893_s2 = inlined_call_operand.hbm [shape: f32[1,384], index: 2, kind: input, shape index: {}]   ;;  %s2894_s3 = inlined_call_operand.hbm [shape: bf16[128,512], index: 3, kind: input, shape index: {}]   ;;  %s2895_s4 = inlined_call_operand.hbm [shape: f32[1,512], index: 4, kind: input, shape index: {}]   ;;  %s2896_s5 = inlined_call_operand.hbm [shape: bf16[128,512], index: 5, kind: input, shape index: {}]   ;;  %s2897_s6 = inlined_call_operand.hbm [shape: bf16[128,128], index: 6, kind: input, shape index: {}]   ;;  %s2898_s7 = inlined_call_operand.vmem [shape: f32[1,128], index: 7, kind: input, shape index: {}]   ;;  %s2899_s8 = inlined_call_operand.hbm [shape: f32[6,8,128], index: 8, kind: output, shape index: {}]  }
   0x1   :  { %14 = vsyncpa [#allocation7], 0 }
   0x2   :  { %15 = vsyncpa [#allocation10], 0 }
   0x3   :  { %16 = vsyncpa [#allocation13], 0  ;;  %s33_s29 = sshll.u32 %s2892_s1, 4  ;;  %s34_s29 = int_to_ptr.hbm [resolvable:$true] %s33_s29 }
   0x4   :  { %17 = vsyncpa [#allocation5], 0  ;;  %s2468_s30 = smov [#allocation6]   ;;  %s57_s12 = sshll.u32 %s2894_s3, 4  ;;  %s58_s12 = int_to_ptr.hbm [resolvable:$true] %s57_s12 }
   0x5   :  { %s35_s9 = sshll.u32 %s2468_s30, 4  ;;  %s2469_s13 = smov 192   ;;  %s36_s9 = int_to_ptr.vmem [resolvable:$true] %s35_s9 }
   0x6   :  { %s2470_s14 = smov 12   ;;  %s2471_s15 = smov [#allocation9]  }
   0x7   :  { %41 = dma.hbm_to_vmem [thread:$0]  %s34_s29, 3072, %s36_s9, [#allocation7], %s2469_s13, %s2469_s13, %s2470_s14  }
   0x8   :  { %s59_s16 = sshll.u32 %s2471_s15, 4  ;;  %s2472_s17 = smov 256   ;;  %s60_s16 = int_to_ptr.vmem [resolvable:$true] %s59_s16 }
   0x9   :  { %s2473_s18 = smov 16   ;;  %s81_s20 = sshll.u32 %s2896_s5, 4  ;;  %s82_s20 = int_to_ptr.hbm [resolvable:$true] %s81_s20 }
   0xa   :  { %65 = dma.hbm_to_vmem [thread:$0]  %s58_s12, 4096, %s60_s16, [#allocation10], %s2472_s17, %s2472_s17, %s2473_s18  }
   0xb   :  { %s2474_s21 = smov [#allocation12]   ;;  %s23_s24 = sshll.u32 %s2891_s0, 4  ;;  %s24_s24 = int_to_ptr.hbm [resolvable:$true] %s23_s24 }
   0xc   :  { %s83_s22 = sshll.u32 %s2474_s21, 4  ;;  %s2475_s25 = smov [#allocation3]   ;;  %s84_s22 = int_to_ptr.vmem [resolvable:$true] %s83_s22 }
   0xd   :  { %89 = dma.hbm_to_vmem [thread:$0]  %s82_s20, 4096, %s84_s22, [#allocation13], %s2472_s17, %s2472_s17, %s2473_s18  }
   0xe   :  { %s25_s26 = sshll.u32 %s2475_s25, 4  ;;  %s47_s29 = sshll.u32 %s2893_s2, 4  ;;  %s26_s26 = int_to_ptr.vmem [resolvable:$true] %s25_s26  ;;  %s48_s29 = int_to_ptr.hbm [resolvable:$true] %s47_s29 }
   0xf   :  { %28 = dma.hbm_to_vmem [thread:$0]  %s24_s24, 64, %s26_s26, [#allocation4]  }
  0x10   :  { %s71_s9 = sshll.u32 %s2895_s4, 4  ;;  %s2476_s10 = smov [#allocation8]   ;;  %s72_s9 = int_to_ptr.hbm [resolvable:$true] %s71_s9 }
  0x11   :  { %s49_s11 = sshll.u32 %s2476_s10, 4  ;;  %s2477_s0 = smov [#allocation11]   ;;  %s50_s11 = int_to_ptr.vmem [resolvable:$true] %s49_s11 }
  0x12   :  { %52 = dma.hbm_to_vmem [thread:$0]  %s48_s29, 48, %s50_s11, [#allocation7]  }
  0x13   :  { %s73_s12 = sshll.u32 %s2477_s0, 4  ;;  %s94_s15 = sshll.u32 %s2897_s6, 4  ;;  %s74_s12 = int_to_ptr.vmem [resolvable:$true] %s73_s12  ;;  %s95_s15 = int_to_ptr.hbm [resolvable:$true] %s94_s15 }
  0x14   :  { %76 = dma.hbm_to_vmem [thread:$0]  %s72_s9, 64, %s74_s12, [#allocation10]  }
  0x15   :  { %s2478_s2 = smov [#allocation14]   ;;  %s2479_s17 = smov 64  }
  0x16   :  { %s96_s16 = sshll.u32 %s2478_s2, 4  ;;  %s2480_s18 = smov 4   ;;  %s97_s16 = int_to_ptr.vmem [resolvable:$true] %s96_s16 }
  0x17   :  { %102 = dma.hbm_to_vmem [thread:$0]  %s95_s15, 1024, %s97_s16, [#allocation13], %s2479_s17, %s2479_s17, %s2480_s18  }
  0x18   :  { %2458 = dma.done.wait [#allocation4], 64  }
  0x19   :  { %2459 = vsyncadd [#allocation4], 4294967232 }
  0x1a   :  { %2460 = dma.done.wait [#allocation7], 3120  }
  0x1b   :  { %2461 = vsyncadd [#allocation7], 4294964176 }
  0x1c   :  { %2462 = dma.done.wait [#allocation10], 4160  }
  0x1d   :  { %2463 = vsyncadd [#allocation10], 4294963136 }
  0x1e   :  { %2464 = dma.done.wait [#allocation13], 5120  }
  0x1f   :  { %2465 = vsyncadd [#allocation13], 4294962176  ;;  %v1734_v0 = vld [vmem:[#allocation6 + $0xb0] sm:$0xf]  ;;  %v2077_v1 = vld [vmem:[#allocation6 + $0xb8] sm:$0xf0] }
  0x20   :  { %v1722_v2 = vld [vmem:[#allocation6 + $0x98] sm:$0xf]  ;;  %v1735_v3 = vor.u32 %v2077_v1, %v1734_v0  ;;  %v2074_v4 = vld [vmem:[#allocation6 + $0xa0] sm:$0xf0]  ;;  %v1726_v5 = vld [vmem:[#allocation6 + $0xa8] sm:$0xf] }
  0x21   :  { %v1723_v6 = vor.u32 %v2074_v4, %v1722_v2  ;;  %v1710_v7 = vld [vmem:[#allocation6 + $0x80] sm:$0xf]  ;;  %v2076_v8 = vld [vmem:[#allocation6 + $0xb0] sm:$0xf0]  ;;  %v2071_v9 = vld [vmem:[#allocation6 + $0x88] sm:$0xf0] }
  0x22   :  { %328 = vmatpush.bf16.msra.mxu2 %v1735_v3  ;;  %v1727_v10 = vor.u32 %v2076_v8, %v1726_v5  ;;  %v1714_v11 = vld [vmem:[#allocation6 + $0x90] sm:$0xf]  ;;  %v2073_v12 = vld [vmem:[#allocation6 + $0x98] sm:$0xf0]  ;;  %v1711_v14 = vor.u32 %v2071_v9, %v1710_v7  ;;  %v1702_v15 = vld [vmem:[#allocation6 + $0x78] sm:$0xf] }
  0x23   :  { %v1715_v13 = vor.u32 %v2073_v12, %v1714_v11  ;;  %v2070_v16 = vld [vmem:[#allocation6 + $0x80] sm:$0xf0]  ;;  %v1698_v17 = vld [vmem:[#allocation6 + $0x68] sm:$0xf]  ;;  %v2068_v18 = vld [vmem:[#allocation6 + $0x70] sm:$0xf0] }
  0x24   :  { %302 = vmatpush.bf16.msra.mxu0 %v1727_v10  ;;  %v1703_v19 = vor.u32 %v2070_v16, %v1702_v15  ;;  %v1690_v20 = vld [vmem:[#allocation6 + $0x60] sm:$0xf]  ;;  %v2067_v21 = vld [vmem:[#allocation6 + $0x68] sm:$0xf0]  ;;  %v1699_v22 = vor.u32 %v2068_v18, %v1698_v17  ;;  %v1728_v24 = vld [vmem:[#allocation6 + $0xb4] sm:$0xf0] }
  0x25   :  { %v2075_v23 = vld [vmem:[#allocation6 + $0xac] sm:$0xf]  ;;  %v2072_v25 = vld [vmem:[#allocation6 + $0x94] sm:$0xf]  ;;  %v1686_v26 = vld [vmem:[#allocation6 + $0x50] sm:$0xf]  ;;  %v1691_v31 = vor.u32 %v2067_v21, %v1690_v20 }
  0x26   :  { %329 = vmatpush.bf16.msra.mxu2 %v1723_v6  ;;  %v2065_v27 = vld [vmem:[#allocation6 + $0x58] sm:$0xf0]  ;;  %v1731_v28 = vor.u32 %v2075_v23, %v1728_v24  ;;  %v1716_v29 = vld [vmem:[#allocation6 + $0x9c] sm:$0xf0]  ;;  %v1674_v30 = vld [vmem:[#allocation6 + $0x38] sm:$0xf] }
  0x27   :  { %v1678_v32 = vld [vmem:[#allocation6 + $0x48] sm:$0xf]  ;;  %v1719_v33 = vor.u32 %v2072_v25, %v1716_v29  ;;  %v1687_v34 = vor.u32 %v2065_v27, %v1686_v26  ;;  %v2064_v35 = vld [vmem:[#allocation6 + $0x50] sm:$0xf0]  ;;  %v2069_v36 = vld [vmem:[#allocation6 + $0x7c] sm:$0xf] }
  0x28   :  { %303 = vmatpush.bf16.msra.mxu0 %v1715_v13  ;;  %315 = vmatpush.bf16.msra.mxu1 %v1731_v28  ;;  %v1704_v37 = vld [vmem:[#allocation6 + $0x84] sm:$0xf0]  ;;  %v2062_v38 = vld [vmem:[#allocation6 + $0x40] sm:$0xf0]  ;;  %v2108_v40 = vld [vmem:[#allocation9 + $0xec] sm:$0xf0]  ;;  %v1679_v42 = vor.u32 %v2064_v35, %v1678_v32 }
  0x29   :  { %v1850_v39 = vld [vmem:[#allocation9 + $0xe0] sm:$0xf]  ;;  %v1666_v43 = vld [vmem:[#allocation6 + $0x30] sm:$0xf]  ;;  %v2061_v44 = vld [vmem:[#allocation6 + $0x38] sm:$0xf0]  ;;  %v1707_v45 = vor.u32 %v2069_v36, %v1704_v37  ;;  %v1675_v47 = vor.u32 %v2062_v38, %v1674_v30 }
  0x2a   :  { %330 = vmatpush.bf16.msra.mxu2 %v1711_v14  ;;  %v1851_v41 = vor.u32 %v2108_v40, %v1850_v39  ;;  %v2066_v46 = vld [vmem:[#allocation6 + $0x64] sm:$0xf]  ;;  %v1692_v48 = vld [vmem:[#allocation6 + $0x6c] sm:$0xf0]  ;;  %v2104_v50 = vld [vmem:[#allocation9 + $0xcc] sm:$0xf0]  ;;  %v1667_v56 = vor.u32 %v2061_v44, %v1666_v43 }
  0x2b   :  { %v1834_v49 = vld [vmem:[#allocation9 + $0xc0] sm:$0xf]  ;;  %v1662_v51 = vld [vmem:[#allocation6 + $0x20] sm:$0xf]  ;;  %v2059_v52 = vld [vmem:[#allocation6 + $0x28] sm:$0xf0]  ;;  %v1695_v58 = vor.u32 %v2066_v46, %v1692_v48 }
  0x2c   :  { %304 = vmatpush.bf16.msra.mxu0 %v1703_v19  ;;  %316 = vmatpush.bf16.msra.mxu1 %v1719_v33  ;;  %v1835_v53 = vor.u32 %v2104_v50, %v1834_v49  ;;  %v1818_v54 = vld [vmem:[#allocation9 + $0xa0] sm:$0xf]  ;;  %v1650_v55 = vld [vmem:[#allocation6 + $0x8] sm:$0xf]  ;;  %v1654_v57 = vld [vmem:[#allocation6 + $0x18] sm:$0xf]  ;;  %v1663_v60 = vor.u32 %v2059_v52, %v1662_v51 }
  0x2d   :  { %544 = vmatpush.bf16.msra.mxu3 %v1851_v41  ;;  %v2100_v59 = vld [vmem:[#allocation9 + $0xac] sm:$0xf0]  ;;  %v2058_v61 = vld [vmem:[#allocation6 + $0x20] sm:$0xf0]  ;;  %v2063_v62 = vld [vmem:[#allocation6 + $0x4c] sm:$0xf] }
  0x2e   :  { %331 = vmatpush.bf16.msra.mxu2 %v1699_v22  ;;  %v1680_v63 = vld [vmem:[#allocation6 + $0x54] sm:$0xf0]  ;;  %v1819_v0 = vor.u32 %v2100_v59, %v1818_v54  ;;  %v2056_v1 = vld [vmem:[#allocation6 + $0x10] sm:$0xf0]  ;;  %v1802_v2 = vld [vmem:[#allocation9 + $0x80] sm:$0xf]  ;;  %v1655_v6 = vor.u32 %v2058_v61, %v1654_v57 }
  0x2f   :  { %v2096_v3 = vld [vmem:[#allocation9 + $0x8c] sm:$0xf0]  ;;  %v2107_v4 = vld [vmem:[#allocation9 + $0xec] sm:$0xf]  ;;  %v1860_v5 = vld [vmem:[#allocation9 + $0xf8] sm:$0xf0]  ;;  %v1683_v8 = vor.u32 %v2063_v62, %v1680_v63  ;;  %v1651_v9 = vor.u32 %v2056_v1, %v1650_v55 }
  0x30   :  { %305 = vmatpush.bf16.msra.mxu0 %v1691_v31  ;;  %317 = vmatpush.bf16.msra.mxu1 %v1707_v45  ;;  %v1642_v7 = vld [vmem:[#allocation6] sm:$0xf]  ;;  %v2055_v10 = vld [vmem:[#allocation6 + $0x8] sm:$0xf0]  ;;  %v2060_v11 = vld [vmem:[#allocation6 + $0x34] sm:$0xf]  ;;  %v1803_v13 = vor.u32 %v2096_v3, %v1802_v2  ;;  %v1863_v16 = vor.u32 %v2107_v4, %v1860_v5 }
  0x31   :  { %545 = vmatpush.bf16.msra.mxu3 %v1835_v53  ;;  %v1668_v12 = vld [vmem:[#allocation6 + $0x3c] sm:$0xf0]  ;;  %v2106_v14 = vld [vmem:[#allocation9 + $0xe4] sm:$0xf]  ;;  %v1852_v15 = vld [vmem:[#allocation9 + $0xf0] sm:$0xf0]  ;;  %v1643_v22 = vor.u32 %v2055_v10, %v1642_v7 }
  0x32   :  { %332 = vmatpush.bf16.msra.mxu2 %v1687_v34  ;;  %v2103_v17 = vld [vmem:[#allocation9 + $0xcc] sm:$0xf]  ;;  %v1844_v18 = vld [vmem:[#allocation9 + $0xd8] sm:$0xf0]  ;;  %v1786_v19 = vld [vmem:[#allocation9 + $0x60] sm:$0xf]  ;;  %v1671_v23 = vor.u32 %v2060_v11, %v1668_v12  ;;  %v1855_v26 = vor.u32 %v2106_v14, %v1852_v15 }
  0x33   :  { %v2092_v20 = vld [vmem:[#allocation9 + $0x6c] sm:$0xf0]  ;;  %v2550_v21 = vld [vmem:[#allocation3] sm:$0xf]  ;;  %v1656_v25 = vld [vmem:[#allocation6 + $0x24] sm:$0xf0]  ;;  %v1847_v29 = vor.u32 %v2103_v17, %v1844_v18 }
  0x34   :  { %306 = vmatpush.bf16.msra.mxu0 %v1679_v42  ;;  %318 = vmatpush.bf16.msra.mxu1 %v1695_v58  ;;  %v2057_v24 = vld [vmem:[#allocation6 + $0x1c] sm:$0xf]  ;;  %v2102_v27 = vld [vmem:[#allocation9 + $0xc4] sm:$0xf]  ;;  %v1836_v28 = vld [vmem:[#allocation9 + $0xd0] sm:$0xf0]  ;;  %v1787_v31 = vor.u32 %v2092_v20, %v1786_v19 }
  0x35   :  { %546 = vmatpush.bf16.msra.mxu3 %v1819_v0  ;;  %v2099_v30 = vld [vmem:[#allocation9 + $0xac] sm:$0xf]  ;;  %v1828_v32 = vld [vmem:[#allocation9 + $0xb8] sm:$0xf0]  ;;  %v1770_v33 = vld [vmem:[#allocation9 + $0x40] sm:$0xf]  ;;  %v1659_v35 = vor.u32 %v2057_v24, %v1656_v25  ;;  %v1839_v38 = vor.u32 %v2102_v27, %v1836_v28 }
  0x36   :  { %333 = vmatpush.bf16.msra.mxu2 %v1675_v47  ;;  %v2088_v34 = vld [vmem:[#allocation9 + $0x4c] sm:$0xf0]  ;;  %v2054_v36 = vld [vmem:[#allocation6 + $0x4] sm:$0xf]  ;;  %v1644_v37 = vld [vmem:[#allocation6 + $0xc] sm:$0xf0]  ;;  %v1831_v42 = vor.u32 %v2099_v30, %v1828_v32 }
  0x37   :  { %v1858_v39 = vld [vmem:[#allocation9 + $0xe8] sm:$0xf]  ;;  %v2098_v40 = vld [vmem:[#allocation9 + $0xa4] sm:$0xf]  ;;  %v1820_v41 = vld [vmem:[#allocation9 + $0xb0] sm:$0xf0]  ;;  %v1771_v43 = vor.u32 %v2088_v34, %v1770_v33  ;;  %v1647_v49 = vor.u32 %v2054_v36, %v1644_v37 }
  0x38   :  { %307 = vmatpush.bf16.msra.mxu0 %v1667_v56  ;;  %319 = vmatpush.bf16.msra.mxu1 %v1683_v8  ;;  %v2109_v44 = vld [vmem:[#allocation9 + $0xf4] sm:$0xf0]  ;;  %v2095_v45 = vld [vmem:[#allocation9 + $0x8c] sm:$0xf]  ;;  %v1812_v46 = vld [vmem:[#allocation9 + $0x98] sm:$0xf0]  ;;  %v1823_v50 = vor.u32 %v2098_v40, %v1820_v41 }
  0x39   :  { %547 = vmatpush.bf16.msra.mxu3 %v1803_v13  ;;  %v1754_v47 = vld [vmem:[#allocation9 + $0x20] sm:$0xf]  ;;  %v2084_v48 = vld [vmem:[#allocation9 + $0x2c] sm:$0xf0]  ;;  %v1859_v51 = vor.u32 %v2109_v44, %v1858_v39  ;;  %v1842_v52 = vld [vmem:[#allocation9 + $0xc8] sm:$0xf]  ;;  %v1815_v55 = vor.u32 %v2095_v45, %v1812_v46 }
  0x3a   :  { %334 = vmatpush.bf16.msra.mxu2 %v1663_v60  ;;  %v2094_v53 = vld [vmem:[#allocation9 + $0x84] sm:$0xf]  ;;  %v1804_v54 = vld [vmem:[#allocation9 + $0x90] sm:$0xf0]  ;;  %v2105_v56 = vld [vmem:[#allocation9 + $0xd4] sm:$0xf0]  ;;  %v1755_v59 = vor.u32 %v2084_v48, %v1754_v47 }
  0x3b   :  { %v2091_v57 = vld [vmem:[#allocation9 + $0x6c] sm:$0xf]  ;;  %v1796_v58 = vld [vmem:[#allocation9 + $0x78] sm:$0xf0]  ;;  %v1738_v60 = vld [vmem:[#allocation9] sm:$0xf]  ;;  %v1807_v62 = vor.u32 %v2094_v53, %v1804_v54  ;;  %v1843_v1 = vor.u32 %v2105_v56, %v1842_v52 }
  0x3c   :  { %308 = vmatpush.bf16.msra.mxu0 %v1655_v6  ;;  %320 = vmatpush.bf16.msra.mxu1 %v1671_v23  ;;  %v2080_v61 = vld [vmem:[#allocation9 + $0xc] sm:$0xf0]  ;;  %v1978_v63 = vld [vmem:[#allocation12 + $0xe0] sm:$0xf]  ;;  %v2140_v0 = vld [vmem:[#allocation12 + $0xec] sm:$0xf0]  ;;  %v1799_v5 = vor.u32 %v2091_v57, %v1796_v58 }
  0x3d   :  { %548 = vmatpush.bf16.msra.mxu3 %v1787_v31  ;;  %v1826_v2 = vld [vmem:[#allocation9 + $0xa8] sm:$0xf]  ;;  %v2090_v3 = vld [vmem:[#allocation9 + $0x64] sm:$0xf]  ;;  %v1788_v4 = vld [vmem:[#allocation9 + $0x70] sm:$0xf0]  ;;  %v2555_v10 = vor.u32 %v2140_v0, %v1978_v63 }
  0x3e   :  { %335 = vmatpush.bf16.msra.mxu2 %v1651_v9  ;;  %v2101_v6 = vld [vmem:[#allocation9 + $0xb4] sm:$0xf0]  ;;  %v2087_v7 = vld [vmem:[#allocation9 + $0x4c] sm:$0xf]  ;;  %v1780_v8 = vld [vmem:[#allocation9 + $0x58] sm:$0xf0]  ;;  %v1739_v9 = vor.u32 %v2080_v61, %v1738_v60  ;;  %v1791_v11 = vor.u32 %v2090_v3, %v1788_v4 }
  0x3f   :  { %v1962_v12 = vld [vmem:[#allocation12 + $0xc0] sm:$0xf]  ;;  %v2136_v13 = vld [vmem:[#allocation12 + $0xcc] sm:$0xf0]  ;;  %v1827_v14 = vor.u32 %v2101_v6, %v1826_v2  ;;  %v1810_v15 = vld [vmem:[#allocation9 + $0x88] sm:$0xf]  ;;  %v1783_v18 = vor.u32 %v2087_v7, %v1780_v8 }
  0x40   :  { %309 = vmatpush.bf16.msra.mxu0 %v1643_v22  ;;  %321 = vmatpush.bf16.msra.mxu1 %v1659_v35  ;;  %v1772_v17 = vld [vmem:[#allocation9 + $0x50] sm:$0xf0]  ;;  %v2097_v19 = vld [vmem:[#allocation9 + $0x94] sm:$0xf0]  ;;  %v2083_v20 = vld [vmem:[#allocation9 + $0x2c] sm:$0xf] }
  0x41   :  { %336 = vmatmul.bf16.vlgmr.msra.gmra.mxu2 %v2550_v21  ;;  %549 = vmatpush.bf16.msra.mxu3 %v1771_v43  ;;  %v1764_v22 = vld [vmem:[#allocation9 + $0x38] sm:$0xf0]  ;;  %v1946_v24 = vld [vmem:[#allocation12 + $0xa0] sm:$0xf]  ;;  %v2132_v25 = vld [vmem:[#allocation12 + $0xac] sm:$0xf0] }
  0x42   :  { %583 = vmatpush.bf16.msrb.mxu2 %v1863_v16  ;;  %v2086_v16 = vld [vmem:[#allocation9 + $0x44] sm:$0xf]  ;;  %v1794_v27 = vld [vmem:[#allocation9 + $0x68] sm:$0xf]  ;;  %v1767_v30 = vor.u32 %v2083_v20, %v1764_v22  ;;  %v2093_v31 = vld [vmem:[#allocation9 + $0x74] sm:$0xf0]  ;;  %v2561_v36 = vor.u32 %v2132_v25, %v1946_v24 }
  0x43   :  { %310 = vmatmul.bf16.vlgmr.msra.gmra.mxu0 %v2550_v21  ;;  %v1775_v23 = vor.u32 %v2086_v16, %v1772_v17  ;;  %v2082_v28 = vld [vmem:[#allocation9 + $0x24] sm:$0xf]  ;;  %v2079_v32 = vld [vmem:[#allocation9 + $0xc] sm:$0xf]  ;;  %v1748_v33 = vld [vmem:[#allocation9 + $0x18] sm:$0xf0] }
  0x44   :  { %557 = vmatpush.bf16.msrb.mxu0 %v1855_v26  ;;  %322 = vmatpush.bf16.msra.mxu1 %v1647_v49  ;;  %v1811_v26 = vor.u32 %v2097_v19, %v1810_v15  ;;  %v2139_v34 = vld [vmem:[#allocation12 + $0xec] sm:$0xf]  ;;  %v1988_v35 = vld [vmem:[#allocation12 + $0xf8] sm:$0xf0]  ;;  %v1778_v39 = vld [vmem:[#allocation9 + $0x48] sm:$0xf] }
  0x45   :  { %550 = vmatpush.bf16.msra.mxu3 %v1755_v59  ;;  %v2078_v40 = vld [vmem:[#allocation9 + $0x4] sm:$0xf]  ;;  %v1740_v41 = vld [vmem:[#allocation9 + $0x10] sm:$0xf0]  ;;  %v2089_v43 = vld [vmem:[#allocation9 + $0x54] sm:$0xf0]  ;;  %v2563_v46 = vor.u32 %v2139_v34, %v1988_v35 }
  0x46   :  { %584 = vmatpush.bf16.msrb.mxu2 %v1847_v29  ;;  %v1756_v29 = vld [vmem:[#allocation9 + $0x30] sm:$0xf0]  ;;  %v2138_v44 = vld [vmem:[#allocation12 + $0xe4] sm:$0xf]  ;;  %v1980_v45 = vld [vmem:[#allocation12 + $0xf0] sm:$0xf0]  ;;  %v1743_v49 = vor.u32 %v2078_v40, %v1740_v41 }
  0x47   :  { %323 = vmatmul.bf16.vlgmr.msra.gmra.mxu1 %v2550_v21  ;;  %v2558_v21 = vor.u32 %v2136_v13, %v1962_v12  ;;  %v1759_v37 = vor.u32 %v2082_v28, %v1756_v29  ;;  %v2135_v47 = vld [vmem:[#allocation12 + $0xcc] sm:$0xf]  ;;  %v1972_v48 = vld [vmem:[#allocation12 + $0xd8] sm:$0xf0]  ;;  %v2566_v52 = vor.u32 %v2138_v44, %v1980_v45  ;;  %v2085_v53 = vld [vmem:[#allocation9 + $0x34] sm:$0xf0] }
  0x48   :  { %558 = vmatpush.bf16.msrb.mxu0 %v1839_v38  ;;  %570 = vmatpush.bf16.msrb.mxu1 %v1859_v51  ;;  %v1795_v38 = vor.u32 %v2093_v31, %v1794_v27  ;;  %v1762_v51 = vld [vmem:[#allocation9 + $0x28] sm:$0xf]  ;;  %v2569_v56 = vor.u32 %v2135_v47, %v1972_v48  ;;  %v2131_v57 = vld [vmem:[#allocation12 + $0xac] sm:$0xf]  ;;  %v1956_v58 = vld [vmem:[#allocation12 + $0xb8] sm:$0xf0] }
  0x49   :  { %551 = vmatpush.bf16.msra.mxu3 %v1739_v9  ;;  %v2134_v54 = vld [vmem:[#allocation12 + $0xc4] sm:$0xf]  ;;  %v1763_v59 = vor.u32 %v2085_v53, %v1762_v51  ;;  %v1948_v0 = vld [vmem:[#allocation12 + $0xb0] sm:$0xf0]  ;;  %v1986_v2 = vld [vmem:[#allocation12 + $0xe8] sm:$0xf] }
  0x4a   :  { %585 = vmatpush.bf16.msrb.mxu2 %v1831_v42  ;;  %v1751_v42 = vor.u32 %v2079_v32, %v1748_v33  ;;  %v1746_v60 = vld [vmem:[#allocation9 + $0x8] sm:$0xf]  ;;  %v2141_v3 = vld [vmem:[#allocation12 + $0xf4] sm:$0xf0]  ;;  %v1970_v7 = vld [vmem:[#allocation12 + $0xc8] sm:$0xf] }
  0x4b   :  { %v2130_v63 = vld [vmem:[#allocation12 + $0xa4] sm:$0xf]  ;;  %v2580_v6 = vor.u32 %v2141_v3, %v1986_v2  ;;  %v2137_v8 = vld [vmem:[#allocation12 + $0xd4] sm:$0xf0]  ;;  %v2128_v15 = vld [vmem:[#allocation12 + $0x8c] sm:$0xf0] }
  0x4c   :  { %559 = vmatpush.bf16.msrb.mxu0 %v1823_v50  ;;  %571 = vmatpush.bf16.msrb.mxu1 %v1843_v1  ;;  %v1779_v50 = vor.u32 %v2089_v43, %v1778_v39  ;;  %v2575_v1 = vor.u32 %v2131_v57, %v1956_v58  ;;  %v2585_v9 = vor.u32 %v2137_v8, %v1970_v7  ;;  %v2133_v12 = vld [vmem:[#allocation12 + $0xb4] sm:$0xf0]  ;;  %v2126_v16 = vld [vmem:[#allocation12 + $0x84] sm:$0xf]  ;;  %v1938_v19 = vld [vmem:[#allocation12 + $0x88] sm:$0xf] }
  0x4d   :  { %789 = vmatpush.bf16.msrb.mxu3 %v2555_v10  ;;  %v2129_v20 = vld [vmem:[#allocation12 + $0x94] sm:$0xf0]  ;;  %v2127_v24 = vld [vmem:[#allocation12 + $0x8c] sm:$0xf]  ;;  %v1940_v25 = vld [vmem:[#allocation12 + $0x98] sm:$0xf0] }
  0x4e   :  { %586 = vmatpush.bf16.msrb.mxu2 %v1815_v55  ;;  %v1964_v55 = vld [vmem:[#allocation12 + $0xd0] sm:$0xf0]  ;;  %v1914_v27 = vld [vmem:[#allocation12 + $0x60] sm:$0xf]  ;;  %v2124_v28 = vld [vmem:[#allocation12 + $0x6c] sm:$0xf0] }
  0x4f   :  { %v2572_v61 = vor.u32 %v2134_v54, %v1964_v55  ;;  %v2122_v29 = vld [vmem:[#allocation12 + $0x64] sm:$0xf]  ;;  %v1916_v31 = vld [vmem:[#allocation12 + $0x70] sm:$0xf0]  ;;  %v1922_v32 = vld [vmem:[#allocation12 + $0x68] sm:$0xf] }
  0x50   :  { %560 = vmatpush.bf16.msrb.mxu0 %v1807_v62  ;;  %572 = vmatpush.bf16.msrb.mxu1 %v1827_v14  ;;  %v2081_v62 = vld [vmem:[#allocation9 + $0x14] sm:$0xf0]  ;;  %v1930_v14 = vld [vmem:[#allocation12 + $0x80] sm:$0xf]  ;;  %v2125_v33 = vld [vmem:[#allocation12 + $0x74] sm:$0xf0]  ;;  %v2605_v34 = vor.u32 %v2122_v29, %v1916_v31 }
  0x51   :  { %790 = vmatpush.bf16.msrb.mxu3 %v2558_v21  ;;  %v1747_v4 = vor.u32 %v2081_v62, %v1746_v60  ;;  %v2591_v17 = vor.u32 %v2128_v15, %v1930_v14  ;;  %v2607_v35 = vor.u32 %v2125_v33, %v1922_v32  ;;  %v1898_v40 = vld [vmem:[#allocation12 + $0x40] sm:$0xf]  ;;  %v2120_v41 = vld [vmem:[#allocation12 + $0x4c] sm:$0xf0]  ;;  %v1900_v44 = vld [vmem:[#allocation12 + $0x50] sm:$0xf0] }
  0x52   :  { %587 = vmatpush.bf16.msrb.mxu2 %v1799_v5  ;;  %v2578_v5 = vor.u32 %v2130_v63, %v1948_v0  ;;  %v2615_v43 = vor.u32 %v2120_v41, %v1898_v40  ;;  %v1906_v45 = vld [vmem:[#allocation12 + $0x48] sm:$0xf]  ;;  %v2121_v47 = vld [vmem:[#allocation12 + $0x54] sm:$0xf0]  ;;  %v1908_v51 = vld [vmem:[#allocation12 + $0x58] sm:$0xf0] }
  0x53   :  { %v1882_v53 = vld [vmem:[#allocation12 + $0x20] sm:$0xf]  ;;  %v2116_v55 = vld [vmem:[#allocation12 + $0x2c] sm:$0xf0]  ;;  %v2114_v57 = vld [vmem:[#allocation12 + $0x24] sm:$0xf] }
  0x54   :  { %561 = vmatpush.bf16.msrb.mxu0 %v1791_v11  ;;  %573 = vmatpush.bf16.msrb.mxu1 %v1811_v26  ;;  %v1954_v11 = vld [vmem:[#allocation12 + $0xa8] sm:$0xf]  ;;  %v2598_v26 = vor.u32 %v2127_v24, %v1940_v25  ;;  %v1884_v58 = vld [vmem:[#allocation12 + $0x30] sm:$0xf0]  ;;  %v2117_v63 = vld [vmem:[#allocation12 + $0x34] sm:$0xf0] }
  0x55   :  { %791 = vmatpush.bf16.msrb.mxu3 %v2561_v36  ;;  %v2588_v13 = vor.u32 %v2133_v12, %v1954_v11  ;;  %v2628_v60 = vor.u32 %v2114_v57, %v1884_v58  ;;  %v1890_v62 = vld [vmem:[#allocation12 + $0x28] sm:$0xf]  ;;  %v2115_v0 = vld [vmem:[#allocation12 + $0x2c] sm:$0xf]  ;;  %v1892_v3 = vld [vmem:[#allocation12 + $0x38] sm:$0xf0] }
  0x56   :  { %588 = vmatpush.bf16.msrb.mxu2 %v1783_v18  ;;  %v1932_v18 = vld [vmem:[#allocation12 + $0x90] sm:$0xf0]  ;;  %v2631_v2 = vor.u32 %v2117_v63, %v1890_v62  ;;  %v2112_v7 = vld [vmem:[#allocation12 + $0xc] sm:$0xf0]  ;;  %v2633_v8 = vor.u32 %v2115_v0, %v1892_v3  ;;  %v2110_v11 = vld [vmem:[#allocation12 + $0x4] sm:$0xf] }
  0x57   :  { %v2593_v22 = vor.u32 %v2126_v16, %v1932_v18  ;;  %v1868_v12 = vld [vmem:[#allocation12 + $0x10] sm:$0xf0]  ;;  %v1874_v14 = vld [vmem:[#allocation12 + $0x8] sm:$0xf]  ;;  %v2113_v16 = vld [vmem:[#allocation12 + $0x14] sm:$0xf0] }
  0x58   :  { %562 = vmatpush.bf16.msrb.mxu0 %v1775_v23  ;;  %574 = vmatpush.bf16.msrb.mxu1 %v1795_v38  ;;  %v2595_v23 = vor.u32 %v2129_v20, %v1938_v19  ;;  %v1924_v38 = vld [vmem:[#allocation12 + $0x78] sm:$0xf0]  ;;  %v2111_v18 = vld [vmem:[#allocation12 + $0xc] sm:$0xf]  ;;  %v2640_v20 = vor.u32 %v2110_v11, %v1868_v12  ;;  %v2642_v24 = vor.u32 %v2113_v16, %v1874_v14  ;;  %s1624_s21 = sshll.u32 %s2899_s8, 4  ;;  %s2482_s22 = smov 128   ;;  %s1625_s21 = int_to_ptr.hbm [resolvable:$true] %s1624_s21 }
  0x59   :  { %792 = vmatpush.bf16.msrb.mxu3 %v2591_v17  ;;  %v1876_v19 = vld [vmem:[#allocation12 + $0x18] sm:$0xf0]  ;;  %s2483_s23 = smov 8  }
  0x5a   :  { %589 = vmatpush.bf16.msrb.mxu2 %v1767_v30  ;;  %v2603_v30 = vor.u32 %v2124_v28, %v1914_v27  ;;  %v2645_v25 = vor.u32 %v2111_v18, %v1876_v19  ;;  %v2651_v27 = vld [vmem:[#allocation8] sm:$0x7] }
  0x5b   :  { %v170_v28 = vperm.slane %v2651_v27, 2  ;;  %v168_v41 = vperm.slane %v2651_v27, 0 }
  0x5c   :  { %563 = vmatpush.bf16.msrb.mxu0 %v1759_v37  ;;  %575 = vmatpush.bf16.msrb.mxu1 %v1779_v50  ;;  %v2123_v37 = vld [vmem:[#allocation12 + $0x6c] sm:$0xf] }
  0x5d   :  { %793 = vmatpush.bf16.msrb.mxu3 %v2603_v30  ;;  %v2610_v39 = vor.u32 %v2123_v37, %v1924_v38  ;;  %v2119_v50 = vld [vmem:[#allocation12 + $0x4c] sm:$0xf] }
  0x5e   :  { %590 = vmatpush.bf16.msrb.mxu2 %v1751_v42  ;;  %v2118_v42 = vld [vmem:[#allocation12 + $0x44] sm:$0xf]  ;;  %v2622_v54 = vor.u32 %v2119_v50, %v1908_v51 }
  0x5f   :  { %v2617_v48 = vor.u32 %v2118_v42, %v1900_v44 }
  0x60   :  { %564 = vmatpush.bf16.msrb.mxu0 %v1743_v49  ;;  %576 = vmatpush.bf16.msrb.mxu1 %v1763_v59  ;;  %v2619_v49 = vor.u32 %v2121_v47, %v1906_v45  ;;  %v2626_v59 = vor.u32 %v2116_v55, %v1882_v53  ;;  %v374_v55 = vld [vmem:[#allocation11] sm:$0xf] }
  0x61   :  { %794 = vmatpush.bf16.msrb.mxu3 %v2615_v43  ;;  %v377_v62 = vperm.slane %v374_v55, 1  ;;  %v379_v14 = vperm.slane %v374_v55, 3 }
  0x62   :  { %828 = vmatpush.bf16.msra.mxu2 %v2563_v46 }
  0x64   :  { %802 = vmatpush.bf16.msra.mxu0 %v2566_v52  ;;  %577 = vmatpush.bf16.msrb.mxu1 %v1747_v4  ;;  %v1866_v4 = vld [vmem:[#allocation12] sm:$0xf] }
  0x65   :  { %795 = vmatpush.bf16.msrb.mxu3 %v2626_v59  ;;  %v2636_v15 = vor.u32 %v2112_v7, %v1866_v4  ;;  %v376_v7 = vperm.slane %v374_v55, 0 }
  0x66   :  { %829 = vmatpush.bf16.msra.mxu2 %v2569_v56 }
  0x68   :  { %803 = vmatpush.bf16.msra.mxu0 %v2572_v61  ;;  %815 = vmatpush.bf16.msra.mxu1 %v2580_v6 }
  0x69   :  { %796 = vmatpush.bf16.msrb.mxu3 %v2636_v15 }
  0x6a   :  { %830 = vmatpush.bf16.msra.mxu2 %v2575_v1 }
  0x6c   :  { %804 = vmatpush.bf16.msra.mxu0 %v2578_v5  ;;  %816 = vmatpush.bf16.msra.mxu1 %v2585_v9 }
  0x6e   :  { %831 = vmatpush.bf16.msra.mxu2 %v2598_v26 }
  0x70   :  { %817 = vmatpush.bf16.msra.mxu1 %v2588_v13  ;;  %805 = vmatpush.bf16.msra.mxu0 %v2593_v22 }
  0x72   :  { %832 = vmatpush.bf16.msra.mxu2 %v2610_v39 }
  0x74   :  { %818 = vmatpush.bf16.msra.mxu1 %v2595_v23  ;;  %806 = vmatpush.bf16.msra.mxu0 %v2605_v34 }
  0x76   :  { %833 = vmatpush.bf16.msra.mxu2 %v2622_v54 }
  0x78   :  { %819 = vmatpush.bf16.msra.mxu1 %v2607_v35  ;;  %807 = vmatpush.bf16.msra.mxu0 %v2617_v48 }
  0x7a   :  { %834 = vmatpush.bf16.msra.mxu2 %v2633_v8 }
  0x7c   :  { %820 = vmatpush.bf16.msra.mxu1 %v2619_v49  ;;  %808 = vmatpush.bf16.msra.mxu0 %v2628_v60 }
  0x7e   :  { %835 = vmatpush.bf16.msra.mxu2 %v2645_v25 }
  0x80   :  { %821 = vmatpush.bf16.msra.mxu1 %v2631_v2  ;;  %809 = vmatpush.bf16.msra.mxu0 %v2640_v20 }
  0x84   :  { %822 = vmatpush.bf16.msra.mxu1 %v2642_v24 }
  0xc0   :  { %v311_v29 = vpop.f32.mrf.mxu0 }
  0xc1   :  { %v312_v42 = vadd.f32 %v311_v29, %v168_v41 }
  0xc3   :  { %v628_v45 = vpack.c.bf16 %v312_v42, %v312_v42 }
  0xc4   :  { %v337_v31 = vpop.f32.mrf.mxu2  ;;  %v2654_v38 = vpop.f32.mrf.mxu1 }
  0xc5   :  { %v338_v32 = vadd.f32 %v337_v31, %v170_v28 }
  0xc7   :  { %v341_v33 = vpack.c.bf16 %v338_v32, %v338_v32 }
  0xc8   :  { %v313_v37 = vpop.f32.mrf.mxu0 }
  0xc9   :  { %552 = vmatmul.bf16.vlgmr.msra.gmra.mxu3 %v341_v33  ;;  %565 = vmatmul.bf16.vlgmr.msrb.gmra.mxu0 %v341_v33 }
  0xca   :  { %578 = vmatmul.bf16.vlgmr.msrb.gmra.mxu1 %v341_v33  ;;  %591 = vmatmul.bf16.vlgmr.msrb.gmra.mxu2 %v341_v33 }
  0xcb   :  { %906 = vmatpush.bf16.msra.mxu3 %v2555_v10  ;;  %919 = vmatpush.bf16.msrb.mxu0 %v2566_v52 }
  0xcc   :  { %v339_v40 = vpop.f32.mrf.mxu2  ;;  %932 = vmatpush.bf16.msrb.mxu1 %v2580_v6  ;;  %945 = vmatpush.bf16.msrb.mxu2 %v2563_v46  ;;  %v326_v44 = vpop.f32.mrf.mxu1 }
  0xcf   :  { %907 = vmatpush.bf16.msra.mxu3 %v2558_v21  ;;  %920 = vmatpush.bf16.msrb.mxu0 %v2572_v61 }
  0xd0   :  { %933 = vmatpush.bf16.msrb.mxu1 %v2585_v9  ;;  %946 = vmatpush.bf16.msrb.mxu2 %v2569_v56 }
  0xd3   :  { %908 = vmatpush.bf16.msra.mxu3 %v2561_v36  ;;  %921 = vmatpush.bf16.msrb.mxu0 %v2578_v5 }
  0xd4   :  { %934 = vmatpush.bf16.msrb.mxu1 %v2588_v13  ;;  %947 = vmatpush.bf16.msrb.mxu2 %v2575_v1 }
  0xd7   :  { %909 = vmatpush.bf16.msra.mxu3 %v2591_v17  ;;  %922 = vmatpush.bf16.msrb.mxu0 %v2593_v22 }
  0xd8   :  { %935 = vmatpush.bf16.msrb.mxu1 %v2595_v23  ;;  %948 = vmatpush.bf16.msrb.mxu2 %v2598_v26 }
  0xd9   :  { %797 = vmatmul.bf16.vlgmr.msrb.gmra.mxu3 %v628_v45  ;;  %810 = vmatmul.bf16.vlgmr.msra.gmra.mxu0 %v628_v45 }
  0xda   :  { %823 = vmatmul.bf16.vlgmr.msra.gmra.mxu1 %v628_v45  ;;  %836 = vmatmul.bf16.vlgmr.msra.gmra.mxu2 %v628_v45 }
  0xdb   :  { %910 = vmatpush.bf16.msra.mxu3 %v2603_v30  ;;  %923 = vmatpush.bf16.msrb.mxu0 %v2605_v34 }
  0xdc   :  { %936 = vmatpush.bf16.msrb.mxu1 %v2607_v35  ;;  %949 = vmatpush.bf16.msrb.mxu2 %v2610_v39 }
  0xdf   :  { %911 = vmatpush.bf16.msra.mxu3 %v2615_v43  ;;  %924 = vmatpush.bf16.msrb.mxu0 %v2617_v48 }
  0xe0   :  { %937 = vmatpush.bf16.msrb.mxu1 %v2619_v49  ;;  %950 = vmatpush.bf16.msrb.mxu2 %v2622_v54 }
  0xe3   :  { %912 = vmatpush.bf16.msra.mxu3 %v2626_v59  ;;  %925 = vmatpush.bf16.msrb.mxu0 %v2628_v60 }
  0xe4   :  { %938 = vmatpush.bf16.msrb.mxu1 %v2631_v2  ;;  %951 = vmatpush.bf16.msrb.mxu2 %v2633_v8 }
  0xe7   :  { %913 = vmatpush.bf16.msra.mxu3 %v2636_v15  ;;  %926 = vmatpush.bf16.msrb.mxu0 %v2640_v20 }
  0xe8   :  { %939 = vmatpush.bf16.msrb.mxu1 %v2642_v24  ;;  %952 = vmatpush.bf16.msrb.mxu2 %v2645_v25 }
  0xeb   :  { %1024 = vmatpush.bf16.msrb.mxu3 %v2555_v10  ;;  %1037 = vmatpush.bf16.msra.mxu0 %v2566_v52 }
  0xec   :  { %1050 = vmatpush.bf16.msra.mxu1 %v2580_v6  ;;  %1063 = vmatpush.bf16.msra.mxu2 %v2563_v46 }
  0xef   :  { %1025 = vmatpush.bf16.msrb.mxu3 %v2558_v21  ;;  %1038 = vmatpush.bf16.msra.mxu0 %v2572_v61 }
  0xf0   :  { %1051 = vmatpush.bf16.msra.mxu1 %v2585_v9  ;;  %1064 = vmatpush.bf16.msra.mxu2 %v2569_v56 }
  0xf3   :  { %1026 = vmatpush.bf16.msrb.mxu3 %v2561_v36  ;;  %1039 = vmatpush.bf16.msra.mxu0 %v2578_v5 }
  0xf4   :  { %1052 = vmatpush.bf16.msra.mxu1 %v2588_v13  ;;  %1065 = vmatpush.bf16.msra.mxu2 %v2575_v1 }
  0xf7   :  { %1027 = vmatpush.bf16.msrb.mxu3 %v2591_v17  ;;  %1040 = vmatpush.bf16.msra.mxu0 %v2593_v22 }
  0xf8   :  { %1053 = vmatpush.bf16.msra.mxu1 %v2595_v23  ;;  %1066 = vmatpush.bf16.msra.mxu2 %v2598_v26 }
  0xfb   :  { %1028 = vmatpush.bf16.msrb.mxu3 %v2603_v30  ;;  %1041 = vmatpush.bf16.msra.mxu0 %v2605_v34 }
  0xfc   :  { %1054 = vmatpush.bf16.msra.mxu1 %v2607_v35  ;;  %1067 = vmatpush.bf16.msra.mxu2 %v2610_v39 }
  0xff   :  { %1029 = vmatpush.bf16.msrb.mxu3 %v2615_v43  ;;  %1042 = vmatpush.bf16.msra.mxu0 %v2617_v48 }
 0x100   :  { %1055 = vmatpush.bf16.msra.mxu1 %v2619_v49  ;;  %1068 = vmatpush.bf16.msra.mxu2 %v2622_v54 }
 0x103   :  { %1030 = vmatpush.bf16.msrb.mxu3 %v2626_v59  ;;  %1043 = vmatpush.bf16.msra.mxu0 %v2628_v60 }
 0x104   :  { %1056 = vmatpush.bf16.msra.mxu1 %v2631_v2  ;;  %1069 = vmatpush.bf16.msra.mxu2 %v2633_v8 }
 0x107   :  { %1031 = vmatpush.bf16.msrb.mxu3 %v2636_v15  ;;  %1044 = vmatpush.bf16.msra.mxu0 %v2640_v20 }
 0x108   :  { %1057 = vmatpush.bf16.msra.mxu1 %v2642_v24  ;;  %1070 = vmatpush.bf16.msra.mxu2 %v2645_v25 }
 0x146   :  { %v566_v47 = vpop.f32.mrf.mxu0 }
 0x147   :  { %v579_v50 = vpop.f32.mrf.mxu1  ;;  %v2721_v0 = vadd.f32 %v566_v47, %v377_v62 }
 0x14c   :  { %v553_v51 = vpop.f32.mrf.mxu3 }
 0x14d   :  { %v592_v53 = vpop.f32.mrf.mxu2  ;;  %v2724_v18 = vadd.f32 %v553_v51, %v376_v7 }
 0x14e   :  { %v568_v57 = vpop.f32.mrf.mxu0  ;;  %v2726_v19 = vadd.f32 %v592_v53, %v379_v14 }
 0x14f   :  { %v581_v58 = vpop.f32.mrf.mxu1 }
 0x154   :  { %v555_v63 = vpop.f32.mrf.mxu3 }
 0x155   :  { %v594_v3 = vpop.f32.mrf.mxu2  ;;  %v378_v63 = vperm.slane %v374_v55, 2  ;;  %v169_v55 = vperm.slane %v2651_v27, 1 }
 0x156   :  { %v811_v4 = vpop.f32.mrf.mxu0 }
 0x157   :  { %v812_v11 = vadd.f32 %v811_v4, %v2721_v0  ;;  %v824_v12 = vpop.f32.mrf.mxu1  ;;  %v2730_v7 = vadd.f32 %v579_v50, %v378_v63 }
 0x159   :  { %v1993_v16 = vmul.f32 -1.442695, %v812_v11 }
 0x15b   :  { %2170 = vpow2.f32 %v1993_v16  ;;  %v825_v16 = vadd.f32 %v824_v12, %v2730_v7 }
 0x15c   :  { %v798_v28 = vpop.f32.mrf.mxu3 }
 0x15d   :  { %v799_v29 = vadd.f32 %v798_v28, %v2724_v18  ;;  %v837_v31 = vpop.f32.mrf.mxu2 }
 0x15e   :  { %v838_v32 = vadd.f32 %v837_v31, %v2726_v19  ;;  %v813_v33 = vpop.f32.mrf.mxu0 }
 0x15f   :  { %v1992_v37 = vmul.f32 -1.442695, %v799_v29  ;;  %v826_v40 = vpop.f32.mrf.mxu1 }
 0x160   :  { %v1994_v41 = vmul.f32 -1.442695, %v838_v32 }
 0x161   :  { %v2171_v42 = vpop.eup %2170  ;;  %2172 = vpow2.f32 %v1992_v37 }
 0x162   :  { %v863_v44 = vadd.f32 1.0, %v2171_v42  ;;  %2174 = vpow2.f32 %v1994_v41 }
 0x164   :  { %2176 = vrcp.f32 %v863_v44  ;;  %v800_v45 = vpop.f32.mrf.mxu3  ;;  %v875_v32 = vand.u32 2147483648, %v863_v44  ;;  %vm869_vm1 = vweird.f32 %v863_v44  ;;  %v873_v37 = vand.u32 2147483647, %v863_v44 }
 0x165   :  { %v839_v47 = vpop.f32.mrf.mxu2 }
 0x166   :  { %v876_v47 = vor.u32 1.1754944e-38, %v875_v32  ;;  %vm874_vm4 = vcmp.eq.f32.partialorder %v873_v37, 8.507059e+37 }
 0x167   :  { %v2173_v51 = vpop.eup %2172 }
 0x168   :  { %v2175_v53 = vpop.eup %2174  ;;  %v844_v57 = vadd.f32 1.0, %v2173_v51 }
 0x169   :  { %v883_v58 = vadd.f32 1.0, %v2175_v53 }
 0x16a   :  { %v2177_v62 = vpop.eup %2176  ;;  %2178 = vrcp.f32 %v844_v57  ;;  %v856_v41 = vand.u32 2147483648, %v844_v57  ;;  %v854_v45 = vand.u32 2147483647, %v844_v57  ;;  %vm850_vm5 = vweird.f32 %v844_v57 }
 0x16b   :  { %v865_v3 = vmul.f32 %v2177_v62, %v863_v44  ;;  %2180 = vrcp.f32 %v883_v58  ;;  %vm870_vm0 = vweird.f32 %v2177_v62  ;;  %v325_v44 = vadd.f32 %v2654_v38, %v169_v55 }
 0x16c   :  { %vm871_vm2 = vmor %vm869_vm1, %vm870_vm0  ;;  %2182 = vtanh.f32 %v825_v16  ;;  %v857_v63 = vor.u32 1.1754944e-38, %v856_v41  ;;  %vm855_vm7 = vcmp.eq.f32.partialorder %v854_v45, 8.507059e+37  ;;  %v895_v32 = vand.u32 2147483648, %v883_v58 }
 0x16d   :  { %v866_v4 = vsub.f32 1.0, %v865_v3  ;;  %vm889_vm9 = vweird.f32 %v883_v58 }
 0x16e   :  { %v896_v37 = vor.u32 1.1754944e-38, %v895_v32 }
 0x16f   :  { %v867_v11 = vmul.f32 %v2177_v62, %v866_v4 }
 0x170   :  { %v2179_v14 = vpop.eup %2178 }
 0x171   :  { %v2181_v28 = vpop.eup %2180  ;;  %v868_v29 = vadd.f32 %v2177_v62, %v867_v11  ;;  %v846_v31 = vmul.f32 %v2179_v14, %v844_v57  ;;  %vm851_vm3 = vweird.f32 %v2179_v14  ;;  %v893_v57 = vand.u32 2147483647, %v883_v58 }
 0x172   :  { %v885_v33 = vmul.f32 %v2181_v28, %v883_v58  ;;  %vm852_vm6 = vmor %vm850_vm5, %vm851_vm3  ;;  %v2183_v27 = vpop.eup %2182  ;;  %vm890_vm8 = vweird.f32 %v2181_v28 }
 0x173   :  { %v847_v40 = vsub.f32 1.0, %v846_v31  ;;  %v872_v50 = vsel %vm871_vm2, %v2177_v62, %v868_v29  ;;  %vm891_vm10 = vmor %vm889_vm9, %vm890_vm8  ;;  %vm894_vm11 = vcmp.eq.f32.partialorder %v893_v57, 8.507059e+37 }
 0x174   :  { %v886_v12 = vsub.f32 1.0, %v885_v33  ;;  %v877_v53 = vsel %vm874_vm4, %v876_v47, %v872_v50 }
 0x175   :  { %v848_v42 = vmul.f32 %v2179_v14, %v847_v40  ;;  %v899_v16 = vmul.f32 %v877_v53, %v325_v44 }
 0x176   :  { %v887_v11 = vmul.f32 %v2181_v28, %v886_v12 }
 0x177   :  { %v849_v51 = vadd.f32 %v2179_v14, %v848_v42 }
 0x178   :  { %v888_v31 = vadd.f32 %v2181_v28, %v887_v11 }
 0x179   :  { %v853_v3 = vsel %vm852_vm6, %v2179_v14, %v849_v51 }
 0x17a   :  { %v858_v4 = vsel %vm855_vm7, %v857_v63, %v853_v3  ;;  %v892_v33 = vsel %vm891_vm10, %v2181_v28, %v888_v31 }
 0x17b   :  { %v900_v62 = vmul.f32 %v2183_v27, %v858_v4  ;;  %v897_v14 = vsel %vm894_vm11, %v896_v37, %v892_v33 }
 0x17d   :  { %v2735_v29 = vadd.f32 %v900_v62, %v899_v16 }
 0x17f   :  { %2184 = vtanh.f32 %v2735_v29 }
 0x185   :  { %v2185_v38 = vpop.eup %2184 }
 0x186   :  { %v903_v40 = vmul.f32 %v2185_v38, %v897_v14 }
 0x188   :  { %v904_v55 = vpack.c.bf16 %v903_v40, %v903_v40 }
 0x18a   :  { %905 = vst [vmem:[#allocation2] sm:$0xf] %v904_v55  ;;  %914 = vmatmul.bf16.vlgmr.msra.gmra.mxu3 %v904_v55  ;;  %927 = vmatmul.bf16.vlgmr.msrb.gmra.mxu0 %v904_v55 }
 0x18b   :  { %940 = vmatmul.bf16.vlgmr.msrb.gmra.mxu1 %v904_v55  ;;  %953 = vmatmul.bf16.vlgmr.msrb.gmra.mxu2 %v904_v55 }
 0x18c   :  { %1142 = vmatpush.bf16.msra.mxu3 %v2555_v10  ;;  %1155 = vmatpush.bf16.msrb.mxu0 %v2566_v52 }
 0x18d   :  { %1168 = vmatpush.bf16.msrb.mxu1 %v2580_v6  ;;  %1181 = vmatpush.bf16.msrb.mxu2 %v2563_v46 }
 0x190   :  { %1143 = vmatpush.bf16.msra.mxu3 %v2558_v21  ;;  %1156 = vmatpush.bf16.msrb.mxu0 %v2572_v61 }
 0x191   :  { %1169 = vmatpush.bf16.msrb.mxu1 %v2585_v9  ;;  %1182 = vmatpush.bf16.msrb.mxu2 %v2569_v56 }
 0x194   :  { %1144 = vmatpush.bf16.msra.mxu3 %v2561_v36  ;;  %1157 = vmatpush.bf16.msrb.mxu0 %v2578_v5 }
 0x195   :  { %1170 = vmatpush.bf16.msrb.mxu1 %v2588_v13  ;;  %1183 = vmatpush.bf16.msrb.mxu2 %v2575_v1 }
 0x198   :  { %1145 = vmatpush.bf16.msra.mxu3 %v2591_v17  ;;  %1158 = vmatpush.bf16.msrb.mxu0 %v2593_v22 }
 0x199   :  { %1171 = vmatpush.bf16.msrb.mxu1 %v2595_v23  ;;  %1184 = vmatpush.bf16.msrb.mxu2 %v2598_v26 }
 0x19c   :  { %1146 = vmatpush.bf16.msra.mxu3 %v2603_v30  ;;  %1159 = vmatpush.bf16.msrb.mxu0 %v2605_v34 }
 0x19d   :  { %1172 = vmatpush.bf16.msrb.mxu1 %v2607_v35  ;;  %1185 = vmatpush.bf16.msrb.mxu2 %v2610_v39 }
 0x1a0   :  { %1147 = vmatpush.bf16.msra.mxu3 %v2615_v43  ;;  %1160 = vmatpush.bf16.msrb.mxu0 %v2617_v48 }
 0x1a1   :  { %1173 = vmatpush.bf16.msrb.mxu1 %v2619_v49  ;;  %1186 = vmatpush.bf16.msrb.mxu2 %v2622_v54 }
 0x1a4   :  { %1148 = vmatpush.bf16.msra.mxu3 %v2626_v59  ;;  %1161 = vmatpush.bf16.msrb.mxu0 %v2628_v60 }
 0x1a5   :  { %1174 = vmatpush.bf16.msrb.mxu1 %v2631_v2  ;;  %1187 = vmatpush.bf16.msrb.mxu2 %v2633_v8 }
 0x1a8   :  { %1149 = vmatpush.bf16.msra.mxu3 %v2636_v15  ;;  %1162 = vmatpush.bf16.msrb.mxu0 %v2640_v20 }
 0x1a9   :  { %1175 = vmatpush.bf16.msrb.mxu1 %v2642_v24  ;;  %1188 = vmatpush.bf16.msrb.mxu2 %v2645_v25 }
 0x207   :  { %v928_v58 = vpop.f32.mrf.mxu0 }
 0x208   :  { %v929_v28 = vadd.f32 %v928_v58, %v2721_v0  ;;  %v941_v41 = vpop.f32.mrf.mxu1 }
 0x209   :  { %v942_v40 = vadd.f32 %v941_v41, %v2730_v7 }
 0x20a   :  { %v1996_v50 = vmul.f32 -1.442695, %v929_v28 }
 0x20c   :  { %2186 = vpow2.f32 %v1996_v50 }
 0x20d   :  { %v915_v42 = vpop.f32.mrf.mxu3 }
 0x20e   :  { %v916_v45 = vadd.f32 %v915_v42, %v2724_v18  ;;  %v954_v47 = vpop.f32.mrf.mxu2 }
 0x20f   :  { %v955_v12 = vadd.f32 %v954_v47, %v2726_v19  ;;  %v930_v51 = vpop.f32.mrf.mxu0 }
 0x210   :  { %v1995_v53 = vmul.f32 -1.442695, %v916_v45  ;;  %v943_v63 = vpop.f32.mrf.mxu1 }
 0x211   :  { %v1997_v44 = vmul.f32 -1.442695, %v955_v12 }
 0x212   :  { %v2187_v3 = vpop.eup %2186  ;;  %2188 = vpow2.f32 %v1995_v53 }
 0x213   :  { %v980_v27 = vadd.f32 1.0, %v2187_v3  ;;  %2190 = vpow2.f32 %v1997_v44 }
 0x215   :  { %2192 = vrcp.f32 %v980_v27  ;;  %v917_v4 = vpop.f32.mrf.mxu3  ;;  %v992_v50 = vand.u32 2147483648, %v980_v27  ;;  %vm986_vm13 = vweird.f32 %v980_v27  ;;  %v990_v45 = vand.u32 2147483647, %v980_v27 }
 0x216   :  { %v956_v11 = vpop.f32.mrf.mxu2 }
 0x217   :  { %v993_v44 = vor.u32 1.1754944e-38, %v992_v50  ;;  %vm991_vm0 = vcmp.eq.f32.partialorder %v990_v45, 8.507059e+37 }
 0x218   :  { %v2189_v16 = vpop.eup %2188 }
 0x219   :  { %v2191_v62 = vpop.eup %2190  ;;  %v961_v31 = vadd.f32 1.0, %v2189_v16 }
 0x21a   :  { %v1000_v32 = vadd.f32 1.0, %v2191_v62 }
 0x21b   :  { %v2193_v57 = vpop.eup %2192  ;;  %2194 = vrcp.f32 %v961_v31  ;;  %v973_v12 = vand.u32 2147483648, %v961_v31  ;;  %v971_v63 = vand.u32 2147483647, %v961_v31  ;;  %vm967_vm1 = vweird.f32 %v961_v31 }
 0x21c   :  { %v982_v33 = vmul.f32 %v2193_v57, %v980_v27  ;;  %2196 = vrcp.f32 %v1000_v32  ;;  %vm987_vm12 = vweird.f32 %v2193_v57  ;;  %vm1006_vm5 = vweird.f32 %v1000_v32 }
 0x21d   :  { %vm988_vm14 = vmor %vm986_vm13, %vm987_vm12  ;;  %2198 = vtanh.f32 %v942_v40  ;;  %v974_v11 = vor.u32 1.1754944e-38, %v973_v12  ;;  %vm972_vm3 = vcmp.eq.f32.partialorder %v971_v63, 8.507059e+37 }
 0x21e   :  { %v983_v37 = vsub.f32 1.0, %v982_v33 }
 0x220   :  { %v984_v38 = vmul.f32 %v2193_v57, %v983_v37 }
 0x221   :  { %v2195_v14 = vpop.eup %2194 }
 0x222   :  { %v2197_v55 = vpop.eup %2196  ;;  %v985_v58 = vadd.f32 %v2193_v57, %v984_v38  ;;  %v963_v28 = vmul.f32 %v2195_v14, %v961_v31  ;;  %vm968_vm15 = vweird.f32 %v2195_v14  ;;  %v1010_v31 = vand.u32 2147483647, %v1000_v32 }
 0x223   :  { %v1002_v42 = vmul.f32 %v2197_v55, %v1000_v32  ;;  %vm969_vm2 = vmor %vm967_vm1, %vm968_vm15  ;;  %v2199_v62 = vpop.eup %2198  ;;  %vm1007_vm4 = vweird.f32 %v2197_v55 }
 0x224   :  { %v964_v47 = vsub.f32 1.0, %v963_v28  ;;  %v989_v51 = vsel %vm988_vm14, %v2193_v57, %v985_v58  ;;  %v1012_v58 = vand.u32 2147483648, %v1000_v32  ;;  %vm1008_vm6 = vmor %vm1006_vm5, %vm1007_vm4  ;;  %vm1011_vm7 = vcmp.eq.f32.partialorder %v1010_v31, 8.507059e+37 }
 0x225   :  { %v1003_v3 = vsub.f32 1.0, %v1002_v42  ;;  %v994_v4 = vsel %vm991_vm0, %v993_v44, %v989_v51 }
 0x226   :  { %v965_v53 = vmul.f32 %v2195_v14, %v964_v47  ;;  %v1016_v37 = vmul.f32 %v994_v4, %v2735_v29  ;;  %v1013_v50 = vor.u32 1.1754944e-38, %v1012_v58 }
 0x227   :  { %v1004_v33 = vmul.f32 %v2197_v55, %v1003_v3 }
 0x228   :  { %v966_v41 = vadd.f32 %v2195_v14, %v965_v53 }
 0x229   :  { %v1005_v40 = vadd.f32 %v2197_v55, %v1004_v33 }
 0x22a   :  { %v970_v16 = vsel %vm969_vm2, %v2195_v14, %v966_v41 }
 0x22b   :  { %v975_v27 = vsel %vm972_vm3, %v974_v11, %v970_v16  ;;  %v1009_v28 = vsel %vm1008_vm6, %v2197_v55, %v1005_v40 }
 0x22c   :  { %v1017_v38 = vmul.f32 %v2199_v62, %v975_v27  ;;  %v1014_v42 = vsel %vm1011_vm7, %v1013_v50, %v1009_v28 }
 0x22e   :  { %v2775_v57 = vadd.f32 %v1017_v38, %v1016_v37 }
 0x230   :  { %2200 = vtanh.f32 %v2775_v57 }
 0x236   :  { %v2201_v14 = vpop.eup %2200 }
 0x237   :  { %v1020_v45 = vmul.f32 %v2201_v14, %v1014_v42 }
 0x239   :  { %v1021_v47 = vpack.c.bf16 %v1020_v45, %v1020_v45 }
 0x23b   :  { %1023 = vst [vmem:[#allocation2 + $0x4] sm:$0xf] %v1021_v47  ;;  %1032 = vmatmul.bf16.vlgmr.msrb.gmra.mxu3 %v1021_v47  ;;  %1045 = vmatmul.bf16.vlgmr.msra.gmra.mxu0 %v1021_v47 }
 0x23c   :  { %1058 = vmatmul.bf16.vlgmr.msra.gmra.mxu1 %v1021_v47  ;;  %1071 = vmatmul.bf16.vlgmr.msra.gmra.mxu2 %v1021_v47 }
 0x23d   :  { %1260 = vmatpush.bf16.msrb.mxu3 %v2555_v10  ;;  %1273 = vmatpush.bf16.msra.mxu0 %v2566_v52 }
 0x23e   :  { %1286 = vmatpush.bf16.msra.mxu1 %v2580_v6  ;;  %1299 = vmatpush.bf16.msra.mxu2 %v2563_v46 }
 0x241   :  { %1261 = vmatpush.bf16.msrb.mxu3 %v2558_v21  ;;  %1274 = vmatpush.bf16.msra.mxu0 %v2572_v61 }
 0x242   :  { %1287 = vmatpush.bf16.msra.mxu1 %v2585_v9  ;;  %1300 = vmatpush.bf16.msra.mxu2 %v2569_v56 }
 0x245   :  { %1262 = vmatpush.bf16.msrb.mxu3 %v2561_v36  ;;  %1275 = vmatpush.bf16.msra.mxu0 %v2578_v5 }
 0x246   :  { %1288 = vmatpush.bf16.msra.mxu1 %v2588_v13  ;;  %1301 = vmatpush.bf16.msra.mxu2 %v2575_v1 }
 0x249   :  { %1263 = vmatpush.bf16.msrb.mxu3 %v2591_v17  ;;  %1276 = vmatpush.bf16.msra.mxu0 %v2593_v22 }
 0x24a   :  { %1289 = vmatpush.bf16.msra.mxu1 %v2595_v23  ;;  %1302 = vmatpush.bf16.msra.mxu2 %v2598_v26 }
 0x24d   :  { %1264 = vmatpush.bf16.msrb.mxu3 %v2603_v30  ;;  %1277 = vmatpush.bf16.msra.mxu0 %v2605_v34 }
 0x24e   :  { %1290 = vmatpush.bf16.msra.mxu1 %v2607_v35  ;;  %1303 = vmatpush.bf16.msra.mxu2 %v2610_v39 }
 0x251   :  { %1265 = vmatpush.bf16.msrb.mxu3 %v2615_v43  ;;  %1278 = vmatpush.bf16.msra.mxu0 %v2617_v48 }
 0x252   :  { %1291 = vmatpush.bf16.msra.mxu1 %v2619_v49  ;;  %1304 = vmatpush.bf16.msra.mxu2 %v2622_v54 }
 0x255   :  { %1266 = vmatpush.bf16.msrb.mxu3 %v2626_v59  ;;  %1279 = vmatpush.bf16.msra.mxu0 %v2628_v60 }
 0x256   :  { %1292 = vmatpush.bf16.msra.mxu1 %v2631_v2  ;;  %1305 = vmatpush.bf16.msra.mxu2 %v2633_v8 }
 0x259   :  { %1267 = vmatpush.bf16.msrb.mxu3 %v2636_v15  ;;  %1280 = vmatpush.bf16.msra.mxu0 %v2640_v20 }
 0x25a   :  { %1293 = vmatpush.bf16.msra.mxu1 %v2642_v24  ;;  %1306 = vmatpush.bf16.msra.mxu2 %v2645_v25 }
 0x2b8   :  { %v1046_v29 = vpop.f32.mrf.mxu0 }
 0x2b9   :  { %v1047_v32 = vadd.f32 %v1046_v29, %v2721_v0  ;;  %v1059_v55 = vpop.f32.mrf.mxu1 }
 0x2ba   :  { %v1060_v45 = vadd.f32 %v1059_v55, %v2730_v7 }
 0x2bb   :  { %v1999_v12 = vmul.f32 -1.442695, %v1047_v32 }
 0x2bd   :  { %2202 = vpow2.f32 %v1999_v12 }
 0x2be   :  { %v1033_v51 = vpop.f32.mrf.mxu3 }
 0x2bf   :  { %v1034_v53 = vadd.f32 %v1033_v51, %v2724_v18  ;;  %v1072_v63 = vpop.f32.mrf.mxu2 }
 0x2c0   :  { %v1073_v44 = vadd.f32 %v1072_v63, %v2726_v19  ;;  %v1048_v3 = vpop.f32.mrf.mxu0 }
 0x2c1   :  { %v1998_v41 = vmul.f32 -1.442695, %v1034_v53  ;;  %v1061_v4 = vpop.f32.mrf.mxu1 }
 0x2c2   :  { %v2000_v11 = vmul.f32 -1.442695, %v1073_v44 }
 0x2c3   :  { %v2203_v16 = vpop.eup %2202  ;;  %2204 = vpow2.f32 %v1998_v41 }
 0x2c4   :  { %v1098_v62 = vadd.f32 1.0, %v2203_v16  ;;  %2206 = vpow2.f32 %v2000_v11 }
 0x2c6   :  { %2208 = vrcp.f32 %v1098_v62  ;;  %v1035_v27 = vpop.f32.mrf.mxu3  ;;  %v1110_v12 = vand.u32 2147483648, %v1098_v62  ;;  %vm1104_vm9 = vweird.f32 %v1098_v62  ;;  %v1108_v53 = vand.u32 2147483647, %v1098_v62 }
 0x2c7   :  { %v1074_v33 = vpop.f32.mrf.mxu2 }
 0x2c8   :  { %v1111_v11 = vor.u32 1.1754944e-38, %v1110_v12  ;;  %vm1109_vm12 = vcmp.eq.f32.partialorder %v1108_v53, 8.507059e+37 }
 0x2c9   :  { %v2205_v37 = vpop.eup %2204 }
 0x2ca   :  { %v2207_v38 = vpop.eup %2206  ;;  %v1079_v40 = vadd.f32 1.0, %v2205_v37 }
 0x2cb   :  { %v1118_v58 = vadd.f32 1.0, %v2207_v38 }
 0x2cc   :  { %v2209_v31 = vpop.eup %2208  ;;  %2210 = vrcp.f32 %v1079_v40  ;;  %v1091_v44 = vand.u32 2147483648, %v1079_v40  ;;  %v1089_v4 = vand.u32 2147483647, %v1079_v40  ;;  %vm1085_vm13 = vweird.f32 %v1079_v40 }
 0x2cd   :  { %v1100_v28 = vmul.f32 %v2209_v31, %v1098_v62  ;;  %2212 = vrcp.f32 %v1118_v58  ;;  %vm1105_vm8 = vweird.f32 %v2209_v31  ;;  %vm1124_vm1 = vweird.f32 %v1118_v58 }
 0x2ce   :  { %vm1106_vm10 = vmor %vm1104_vm9, %vm1105_vm8  ;;  %2214 = vtanh.f32 %v1060_v45  ;;  %v1092_v33 = vor.u32 1.1754944e-38, %v1091_v44  ;;  %vm1090_vm15 = vcmp.eq.f32.partialorder %v1089_v4, 8.507059e+37 }
 0x2cf   :  { %v1101_v50 = vsub.f32 1.0, %v1100_v28 }
 0x2d1   :  { %v1102_v14 = vmul.f32 %v2209_v31, %v1101_v50 }
 0x2d2   :  { %v2211_v42 = vpop.eup %2210 }
 0x2d3   :  { %v2213_v47 = vpop.eup %2212  ;;  %v1103_v29 = vadd.f32 %v2209_v31, %v1102_v14  ;;  %v1081_v32 = vmul.f32 %v2211_v42, %v1079_v40  ;;  %vm1086_vm11 = vweird.f32 %v2211_v42  ;;  %v1128_v40 = vand.u32 2147483647, %v1118_v58 }
 0x2d4   :  { %v1120_v51 = vmul.f32 %v2213_v47, %v1118_v58  ;;  %vm1087_vm14 = vmor %vm1085_vm13, %vm1086_vm11  ;;  %v2215_v38 = vpop.eup %2214  ;;  %vm1125_vm0 = vweird.f32 %v2213_v47 }
 0x2d5   :  { %v1082_v63 = vsub.f32 1.0, %v1081_v32  ;;  %v1107_v3 = vsel %vm1106_vm10, %v2209_v31, %v1103_v29  ;;  %v1130_v29 = vand.u32 2147483648, %v1118_v58  ;;  %vm1126_vm2 = vmor %vm1124_vm1, %vm1125_vm0  ;;  %vm1129_vm3 = vcmp.eq.f32.partialorder %v1128_v40, 8.507059e+37 }
 0x2d6   :  { %v1121_v16 = vsub.f32 1.0, %v1120_v51  ;;  %v1112_v27 = vsel %vm1109_vm12, %v1111_v11, %v1107_v3 }
 0x2d7   :  { %v1083_v41 = vmul.f32 %v2211_v42, %v1082_v63  ;;  %v1134_v50 = vmul.f32 %v1112_v27, %v2775_v57  ;;  %v1131_v12 = vor.u32 1.1754944e-38, %v1130_v29 }
 0x2d8   :  { %v1122_v28 = vmul.f32 %v2213_v47, %v1121_v16 }
 0x2d9   :  { %v1084_v55 = vadd.f32 %v2211_v42, %v1083_v41 }
 0x2da   :  { %v1123_v45 = vadd.f32 %v2213_v47, %v1122_v28 }
 0x2db   :  { %v1088_v37 = vsel %vm1087_vm14, %v2211_v42, %v1084_v55 }
 0x2dc   :  { %v1093_v62 = vsel %vm1090_vm15, %v1092_v33, %v1088_v37  ;;  %v1127_v32 = vsel %vm1126_vm2, %v2213_v47, %v1123_v45 }
 0x2dd   :  { %v1135_v14 = vmul.f32 %v2215_v38, %v1093_v62  ;;  %v1132_v51 = vsel %vm1129_vm3, %v1131_v12, %v1127_v32 }
 0x2df   :  { %v2815_v31 = vadd.f32 %v1135_v14, %v1134_v50 }
 0x2e1   :  { %2216 = vtanh.f32 %v2815_v31 }
 0x2e7   :  { %v2217_v42 = vpop.eup %2216 }
 0x2e8   :  { %v1138_v53 = vmul.f32 %v2217_v42, %v1132_v51 }
 0x2ea   :  { %v1139_v63 = vpack.c.bf16 %v1138_v53, %v1138_v53 }
 0x2ec   :  { %1141 = vst [vmem:[#allocation2 + $0x8] sm:$0xf] %v1139_v63  ;;  %1150 = vmatmul.bf16.vlgmr.msra.gmra.mxu3 %v1139_v63  ;;  %1163 = vmatmul.bf16.vlgmr.msrb.gmra.mxu0 %v1139_v63 }
 0x2ed   :  { %1176 = vmatmul.bf16.vlgmr.msrb.gmra.mxu1 %v1139_v63  ;;  %1189 = vmatmul.bf16.vlgmr.msrb.gmra.mxu2 %v1139_v63 }
 0x2ee   :  { %1378 = vmatpush.bf16.msra.mxu3 %v2555_v10  ;;  %1391 = vmatpush.bf16.msrb.mxu0 %v2566_v52 }
 0x2ef   :  { %1404 = vmatpush.bf16.msrb.mxu1 %v2580_v6  ;;  %1417 = vmatpush.bf16.msrb.mxu2 %v2563_v46 }
 0x2f2   :  { %1379 = vmatpush.bf16.msra.mxu3 %v2558_v21  ;;  %1392 = vmatpush.bf16.msrb.mxu0 %v2572_v61 }
 0x2f3   :  { %1405 = vmatpush.bf16.msrb.mxu1 %v2585_v9  ;;  %1418 = vmatpush.bf16.msrb.mxu2 %v2569_v56 }
 0x2f6   :  { %1380 = vmatpush.bf16.msra.mxu3 %v2561_v36  ;;  %1393 = vmatpush.bf16.msrb.mxu0 %v2578_v5 }
 0x2f7   :  { %1406 = vmatpush.bf16.msrb.mxu1 %v2588_v13  ;;  %1419 = vmatpush.bf16.msrb.mxu2 %v2575_v1 }
 0x2fa   :  { %1381 = vmatpush.bf16.msra.mxu3 %v2591_v17  ;;  %1394 = vmatpush.bf16.msrb.mxu0 %v2593_v22 }
 0x2fb   :  { %1407 = vmatpush.bf16.msrb.mxu1 %v2595_v23  ;;  %1420 = vmatpush.bf16.msrb.mxu2 %v2598_v26 }
 0x2fe   :  { %1382 = vmatpush.bf16.msra.mxu3 %v2603_v30  ;;  %1395 = vmatpush.bf16.msrb.mxu0 %v2605_v34 }
 0x2ff   :  { %1408 = vmatpush.bf16.msrb.mxu1 %v2607_v35  ;;  %1421 = vmatpush.bf16.msrb.mxu2 %v2610_v39 }
 0x302   :  { %1383 = vmatpush.bf16.msra.mxu3 %v2615_v43  ;;  %1396 = vmatpush.bf16.msrb.mxu0 %v2617_v48 }
 0x303   :  { %1409 = vmatpush.bf16.msrb.mxu1 %v2619_v49  ;;  %1422 = vmatpush.bf16.msrb.mxu2 %v2622_v54 }
 0x306   :  { %1384 = vmatpush.bf16.msra.mxu3 %v2626_v59  ;;  %1397 = vmatpush.bf16.msrb.mxu0 %v2628_v60 }
 0x307   :  { %1410 = vmatpush.bf16.msrb.mxu1 %v2631_v2  ;;  %1423 = vmatpush.bf16.msrb.mxu2 %v2633_v8 }
 0x30a   :  { %1385 = vmatpush.bf16.msra.mxu3 %v2636_v15  ;;  %1398 = vmatpush.bf16.msrb.mxu0 %v2640_v20 }
 0x30b   :  { %1411 = vmatpush.bf16.msrb.mxu1 %v2642_v24  ;;  %1424 = vmatpush.bf16.msrb.mxu2 %v2645_v25 }
 0x369   :  { %v1164_v10 = vpop.f32.mrf.mxu0 }
 0x36a   :  { %v1165_v21 = vadd.f32 %v1164_v10, %v2721_v0  ;;  %v1177_v36 = vpop.f32.mrf.mxu1 }
 0x36b   :  { %v1178_v60 = vadd.f32 %v1177_v36, %v2730_v7  ;;  %v2152_v36 = vld [vmem:[#allocation14 + $0x38] sm:$0xff] }
 0x36c   :  { %v2002_v46 = vmul.f32 -1.442695, %v1165_v21 }
 0x36e   :  { %2218 = vpow2.f32 %v2002_v46 }
 0x36f   :  { %v1151_v52 = vpop.f32.mrf.mxu3 }
 0x370   :  { %v1152_v56 = vadd.f32 %v1151_v52, %v2724_v18  ;;  %v1190_v61 = vpop.f32.mrf.mxu2 }
 0x371   :  { %v1191_v1 = vadd.f32 %v1190_v61, %v2726_v19  ;;  %v1166_v5 = vpop.f32.mrf.mxu0  ;;  %v2151_v61 = vld [vmem:[#allocation14 + $0x30] sm:$0xff] }
 0x372   :  { %v2001_v6 = vmul.f32 -1.442695, %v1152_v56  ;;  %v1179_v9 = vpop.f32.mrf.mxu1 }
 0x373   :  { %v2003_v13 = vmul.f32 -1.442695, %v1191_v1 }
 0x374   :  { %v2219_v17 = vpop.eup %2218  ;;  %2220 = vpow2.f32 %v2001_v6 }
 0x375   :  { %v1216_v22 = vadd.f32 1.0, %v2219_v17  ;;  %2222 = vpow2.f32 %v2003_v13 }
 0x377   :  { %2224 = vrcp.f32 %v1216_v22  ;;  %v1153_v23 = vpop.f32.mrf.mxu3  ;;  %v1228_v20 = vand.u32 2147483648, %v1216_v22  ;;  %vm1222_vm5 = vweird.f32 %v1216_v22  ;;  %v1226_v25 = vand.u32 2147483647, %v1216_v22 }
 0x378   :  { %v1192_v26 = vpop.f32.mrf.mxu2 }
 0x379   :  { %v1229_v41 = vor.u32 1.1754944e-38, %v1228_v20  ;;  %vm1227_vm8 = vcmp.eq.f32.partialorder %v1226_v25, 8.507059e+37 }
 0x37a   :  { %v2221_v30 = vpop.eup %2220 }
 0x37b   :  { %v2223_v34 = vpop.eup %2222  ;;  %v1197_v35 = vadd.f32 1.0, %v2221_v30 }
 0x37c   :  { %v1236_v39 = vadd.f32 1.0, %v2223_v34  ;;  %v2149_v34 = vld [vmem:[#allocation14 + $0x20] sm:$0xff] }
 0x37d   :  { %v2225_v43 = vpop.eup %2224  ;;  %2226 = vrcp.f32 %v1197_v35  ;;  %v1209_v58 = vand.u32 2147483648, %v1197_v35  ;;  %v1207_v3 = vand.u32 2147483647, %v1197_v35  ;;  %vm1203_vm9 = vweird.f32 %v1197_v35 }
 0x37e   :  { %v1218_v48 = vmul.f32 %v2225_v43, %v1216_v22  ;;  %2228 = vrcp.f32 %v1236_v39  ;;  %vm1223_vm4 = vweird.f32 %v2225_v43  ;;  %v1248_v45 = vand.u32 2147483648, %v1236_v39  ;;  %v2150_v22 = vld [vmem:[#allocation14 + $0x28] sm:$0xff] }
 0x37f   :  { %vm1224_vm6 = vmor %vm1222_vm5, %vm1223_vm4  ;;  %2230 = vtanh.f32 %v1178_v60  ;;  %v1210_v55 = vor.u32 1.1754944e-38, %v1209_v58  ;;  %vm1208_vm11 = vcmp.eq.f32.partialorder %v1207_v3, 8.507059e+37  ;;  %vm1242_vm13 = vweird.f32 %v1236_v39  ;;  %v2146_v58 = vld [vmem:[#allocation14 + $0x8] sm:$0xff] }
 0x380   :  { %v1219_v49 = vsub.f32 1.0, %v1218_v48  ;;  %v1246_v29 = vand.u32 2147483647, %v1236_v39  ;;  %v1249_v32 = vor.u32 1.1754944e-38, %v1248_v45 }
 0x382   :  { %v1220_v54 = vmul.f32 %v2225_v43, %v1219_v49  ;;  %vm1247_vm15 = vcmp.eq.f32.partialorder %v1246_v29, 8.507059e+37 }
 0x383   :  { %v2227_v59 = vpop.eup %2226 }
 0x384   :  { %v2229_v2 = vpop.eup %2228  ;;  %v1221_v8 = vadd.f32 %v2225_v43, %v1220_v54  ;;  %v1199_v15 = vmul.f32 %v2227_v59, %v1197_v35  ;;  %vm1204_vm7 = vweird.f32 %v2227_v59 }
 0x385   :  { %v1238_v24 = vmul.f32 %v2229_v2, %v1236_v39  ;;  %vm1205_vm10 = vmor %vm1203_vm9, %vm1204_vm7  ;;  %v2231_v33 = vpop.eup %2230  ;;  %vm1243_vm12 = vweird.f32 %v2229_v2 }
 0x386   :  { %v1200_v57 = vsub.f32 1.0, %v1199_v15  ;;  %v1225_v47 = vsel %vm1224_vm6, %v2225_v43, %v1221_v8  ;;  %vm1244_vm14 = vmor %vm1242_vm13, %vm1243_vm12 }
 0x387   :  { %v1239_v4 = vsub.f32 1.0, %v1238_v24  ;;  %v1230_v16 = vsel %vm1227_vm8, %v1229_v41, %v1225_v47 }
 0x388   :  { %v1201_v44 = vmul.f32 %v2227_v59, %v1200_v57  ;;  %v1252_v62 = vmul.f32 %v1230_v16, %v2815_v31 }
 0x389   :  { %v1240_v38 = vmul.f32 %v2229_v2, %v1239_v4 }
 0x38a   :  { %v1202_v11 = vadd.f32 %v2227_v59, %v1201_v44 }
 0x38b   :  { %v1241_v14 = vadd.f32 %v2229_v2, %v1240_v38 }
 0x38c   :  { %v1206_v27 = vsel %vm1205_vm10, %v2227_v59, %v1202_v11  ;;  %v2148_v59 = vld [vmem:[#allocation14 + $0x18] sm:$0xff] }
 0x38d   :  { %v1211_v37 = vsel %vm1208_vm11, %v1210_v55, %v1206_v27  ;;  %v1245_v40 = vsel %vm1244_vm14, %v2229_v2, %v1241_v14  ;;  %v2147_v2 = vld [vmem:[#allocation14 + $0x10] sm:$0xff]  ;;  %v2145_v27 = vld [vmem:[#allocation14] sm:$0xff] }
 0x38e   :  { %v1253_v28 = vmul.f32 %v2231_v33, %v1211_v37  ;;  %v1250_v42 = vsel %vm1247_vm15, %v1249_v32, %v1245_v40 }
 0x390   :  { %v2855_v50 = vadd.f32 %v1253_v28, %v1252_v62 }
 0x392   :  { %2232 = vtanh.f32 %v2855_v50 }
 0x398   :  { %v2233_v12 = vpop.eup %2232 }
 0x399   :  { %v1256_v51 = vmul.f32 %v2233_v12, %v1250_v42 }
 0x39b   :  { %v1257_v53 = vpack.c.bf16 %v1256_v51, %v1256_v51 }
 0x39d   :  { %1259 = vst [vmem:[#allocation2 + $0xc] sm:$0xf] %v1257_v53  ;;  %1268 = vmatmul.bf16.vlgmr.msrb.gmra.mxu3 %v1257_v53  ;;  %1281 = vmatmul.bf16.vlgmr.msra.gmra.mxu0 %v1257_v53 }
 0x39e   :  { %1294 = vmatmul.bf16.vlgmr.msra.gmra.mxu1 %v1257_v53  ;;  %1307 = vmatmul.bf16.vlgmr.msra.gmra.mxu2 %v1257_v53 }
 0x39f   :  { %1588 = vmatpush.bf16.msrb.mxu3 %v2152_v36 }
 0x3a3   :  { %1589 = vmatpush.bf16.msrb.mxu3 %v2151_v61 }
 0x3a7   :  { %1590 = vmatpush.bf16.msrb.mxu3 %v2150_v22 }
 0x3ab   :  { %1591 = vmatpush.bf16.msrb.mxu3 %v2149_v34 }
 0x3af   :  { %1592 = vmatpush.bf16.msrb.mxu3 %v2148_v59 }
 0x3b3   :  { %1593 = vmatpush.bf16.msrb.mxu3 %v2147_v2 }
 0x3b7   :  { %1594 = vmatpush.bf16.msrb.mxu3 %v2146_v58 }
 0x3bb   :  { %1595 = vmatpush.bf16.msrb.mxu3 %v2145_v27 }
 0x41a   :  { %v1282_v31 = vpop.f32.mrf.mxu0 }
 0x41b   :  { %v1283_v63 = vadd.f32 %v1282_v31, %v2721_v0  ;;  %v1295_v10 = vpop.f32.mrf.mxu1 }
 0x41c   :  { %v1296_v20 = vadd.f32 %v1295_v10, %v2730_v7 }
 0x41d   :  { %v2005_v21 = vmul.f32 -1.442695, %v1283_v63 }
 0x41f   :  { %2234 = vpow2.f32 %v2005_v21 }
 0x420   :  { %v1269_v46 = vpop.f32.mrf.mxu3 }
 0x421   :  { %v1270_v52 = vadd.f32 %v1269_v46, %v2724_v18  ;;  %v1308_v56 = vpop.f32.mrf.mxu2 }
 0x422   :  { %v1309_v1 = vadd.f32 %v1308_v56, %v2726_v19  ;;  %v1284_v5 = vpop.f32.mrf.mxu0  ;;  %v2143_v56 = vld [vmem:[#allocation2 + $0x8] sm:$0xff] }
 0x423   :  { %v2004_v6 = vmul.f32 -1.442695, %v1270_v52  ;;  %v1297_v9 = vpop.f32.mrf.mxu1 }
 0x424   :  { %v2006_v13 = vmul.f32 -1.442695, %v1309_v1 }
 0x425   :  { %v2235_v17 = vpop.eup %2234  ;;  %2236 = vpow2.f32 %v2004_v6 }
 0x426   :  { %v1334_v23 = vadd.f32 1.0, %v2235_v17  ;;  %2238 = vpow2.f32 %v2006_v13 }
 0x428   :  { %2240 = vrcp.f32 %v1334_v23  ;;  %v1271_v26 = vpop.f32.mrf.mxu3  ;;  %v1346_v47 = vand.u32 2147483648, %v1334_v23  ;;  %vm1340_vm1 = vweird.f32 %v1334_v23  ;;  %v1344_v3 = vand.u32 2147483647, %v1334_v23 }
 0x429   :  { %v1310_v30 = vpop.f32.mrf.mxu2 }
 0x42a   :  { %v1347_v33 = vor.u32 1.1754944e-38, %v1346_v47  ;;  %vm1345_vm4 = vcmp.eq.f32.partialorder %v1344_v3, 8.507059e+37 }
 0x42b   :  { %v2237_v35 = vpop.eup %2236 }
 0x42c   :  { %v2239_v39 = vpop.eup %2238  ;;  %v1315_v43 = vadd.f32 1.0, %v2237_v35 }
 0x42d   :  { %v1354_v48 = vadd.f32 1.0, %v2239_v39 }
 0x42e   :  { %v2241_v49 = vpop.eup %2240  ;;  %2242 = vrcp.f32 %v1315_v43  ;;  %v1327_v4 = vand.u32 2147483648, %v1315_v43  ;;  %v1325_v55 = vand.u32 2147483647, %v1315_v43  ;;  %vm1321_vm5 = vweird.f32 %v1315_v43 }
 0x42f   :  { %v1336_v54 = vmul.f32 %v2241_v49, %v1334_v23  ;;  %2244 = vrcp.f32 %v1354_v48  ;;  %vm1341_vm0 = vweird.f32 %v2241_v49  ;;  %v1366_v53 = vand.u32 2147483648, %v1354_v48 }
 0x430   :  { %vm1342_vm2 = vmor %vm1340_vm1, %vm1341_vm0  ;;  %2246 = vtanh.f32 %v1296_v20  ;;  %v1328_v28 = vor.u32 1.1754944e-38, %v1327_v4  ;;  %vm1326_vm7 = vcmp.eq.f32.partialorder %v1325_v55, 8.507059e+37  ;;  %vm1360_vm9 = vweird.f32 %v1354_v48 }
 0x431   :  { %v1337_v60 = vsub.f32 1.0, %v1336_v54  ;;  %v1364_v31 = vand.u32 2147483647, %v1354_v48  ;;  %v1367_v10 = vor.u32 1.1754944e-38, %v1366_v53 }
 0x433   :  { %v1338_v8 = vmul.f32 %v2241_v49, %v1337_v60  ;;  %vm1365_vm11 = vcmp.eq.f32.partialorder %v1364_v31, 8.507059e+37 }
 0x434   :  { %v2243_v15 = vpop.eup %2242 }
 0x435   :  { %v2245_v24 = vpop.eup %2244  ;;  %v1339_v25 = vadd.f32 %v2241_v49, %v1338_v8  ;;  %v1317_v57 = vmul.f32 %v2243_v15, %v1315_v43  ;;  %vm1322_vm3 = vweird.f32 %v2243_v15 }
 0x436   :  { %v1356_v44 = vmul.f32 %v2245_v24, %v1354_v48  ;;  %vm1323_vm6 = vmor %vm1321_vm5, %vm1322_vm3  ;;  %v2247_v45 = vpop.eup %2246  ;;  %vm1361_vm8 = vweird.f32 %v2245_v24 }
 0x437   :  { %v1318_v41 = vsub.f32 1.0, %v1317_v57  ;;  %v1343_v11 = vsel %vm1342_vm2, %v2241_v49, %v1339_v25  ;;  %vm1362_vm10 = vmor %vm1360_vm9, %vm1361_vm8 }
 0x438   :  { %v1357_v37 = vsub.f32 1.0, %v1356_v44  ;;  %v1348_v62 = vsel %vm1345_vm4, %v1347_v33, %v1343_v11 }
 0x439   :  { %v1319_v16 = vmul.f32 %v2243_v15, %v1318_v41  ;;  %v1370_v32 = vmul.f32 %v1348_v62, %v2855_v50  ;;  %v2142_v50 = vld [vmem:[#allocation2] sm:$0xff] }
 0x43a   :  { %v1358_v40 = vmul.f32 %v2245_v24, %v1357_v37 }
 0x43b   :  { %v1320_v38 = vadd.f32 %v2243_v15, %v1319_v16 }
 0x43c   :  { %v1359_v51 = vadd.f32 %v2245_v24, %v1358_v40 }
 0x43d   :  { %v1324_v14 = vsel %vm1323_vm6, %v2243_v15, %v1320_v38 }
 0x43e   :  { %v1329_v29 = vsel %vm1326_vm7, %v1328_v28, %v1324_v14  ;;  %v1363_v63 = vsel %vm1362_vm10, %v2245_v24, %v1359_v51 }
 0x43f   :  { %v1371_v12 = vmul.f32 %v2247_v45, %v1329_v29  ;;  %v1368_v36 = vsel %vm1365_vm11, %v1367_v10, %v1363_v63 }
 0x441   :  { %v2863_v42 = vadd.f32 %v1371_v12, %v1370_v32 }
 0x443   :  { %2248 = vtanh.f32 %v2863_v42 }
 0x449   :  { %v2249_v21 = vpop.eup %2248 }
 0x44a   :  { %v1374_v46 = vmul.f32 %v2249_v21, %v1368_v36 }
 0x44c   :  { %v1375_v52 = vpack.c.bf16 %v1374_v46, %v1374_v46 }
 0x44e   :  { %1377 = vst [vmem:[#allocation2 + $0x10] sm:$0xf] %v1375_v52  ;;  %1386 = vmatmul.bf16.vlgmr.msra.gmra.mxu3 %v1375_v52  ;;  %1399 = vmatmul.bf16.vlgmr.msrb.gmra.mxu0 %v1375_v52 }
 0x44f   :  { %1412 = vmatmul.bf16.vlgmr.msrb.gmra.mxu1 %v1375_v52  ;;  %1425 = vmatmul.bf16.vlgmr.msrb.gmra.mxu2 %v1375_v52 }
 0x45e   :  { %1596 = vmatmul.bf16.vlgmr.msrb.gmra.mxu3 %v2142_v50 }
 0x46e   :  { %1601 = vmatmul.bf16.gmra.mxu3 %v2143_v56 }
 0x4cb   :  { %v1400_v61 = vpop.f32.mrf.mxu0 }
 0x4cc   :  { %v1401_v1 = vadd.f32 %v1400_v61, %v2721_v0  ;;  %v1413_v5 = vpop.f32.mrf.mxu1 }
 0x4cd   :  { %v1414_v25 = vadd.f32 %v1413_v5, %v2730_v7 }
 0x4ce   :  { %v2008_v6 = vmul.f32 -1.442695, %v1401_v1 }
 0x4d0   :  { %2250 = vpow2.f32 %v2008_v6 }
 0x4d1   :  { %v1387_v9 = vpop.f32.mrf.mxu3 }
 0x4d2   :  { %v1388_v13 = vadd.f32 %v1387_v9, %v2724_v18  ;;  %v1426_v17 = vpop.f32.mrf.mxu2  ;;  %v2872_v18 = vld [vmem:[%s2898_s7] ss:$0 sm:$0xff]  ;;  %s2481_s7 = smov [#allocation15]  }
 0x4d3   :  { %v1427_v22 = vadd.f32 %v1426_v17, %v2726_v19  ;;  %v1402_v23 = vpop.f32.mrf.mxu0  ;;  %s1622_s1 = sshll.u32 %s2481_s7, 4  ;;  %s1623_s1 = int_to_ptr.vmem [resolvable:$true] %s1622_s1 }
 0x4d4   :  { %v2007_v26 = vmul.f32 -1.442695, %v1388_v13  ;;  %v1415_v30 = vpop.f32.mrf.mxu1 }
 0x4d5   :  { %v2009_v34 = vmul.f32 -1.442695, %v1427_v22 }
 0x4d6   :  { %v2251_v35 = vpop.eup %2250  ;;  %2252 = vpow2.f32 %v2007_v26 }
 0x4d7   :  { %v1452_v39 = vadd.f32 1.0, %v2251_v35  ;;  %2254 = vpow2.f32 %v2009_v34 }
 0x4d9   :  { %2256 = vrcp.f32 %v1452_v39  ;;  %v1389_v43 = vpop.f32.mrf.mxu3  ;;  %v1464_v44 = vand.u32 2147483648, %v1452_v39  ;;  %vm1458_vm13 = vweird.f32 %v1452_v39  ;;  %v1462_v41 = vand.u32 2147483647, %v1452_v39 }
 0x4da   :  { %v1428_v0 = vpop.f32.mrf.mxu2 }
 0x4db   :  { %v1465_v38 = vor.u32 1.1754944e-38, %v1464_v44  ;;  %vm1463_vm0 = vcmp.eq.f32.partialorder %v1462_v41, 8.507059e+37 }
 0x4dc   :  { %v2253_v48 = vpop.eup %2252 }
 0x4dd   :  { %v2255_v49 = vpop.eup %2254  ;;  %v1433_v54 = vadd.f32 1.0, %v2253_v48 }
 0x4de   :  { %v1472_v59 = vadd.f32 1.0, %v2255_v49 }
 0x4df   :  { %v2257_v19 = vpop.eup %2256  ;;  %2258 = vrcp.f32 %v1433_v54  ;;  %v1443_v16 = vand.u32 2147483647, %v1433_v54  ;;  %v1445_v55 = vand.u32 2147483648, %v1433_v54  ;;  %vm1439_vm1 = vweird.f32 %v1433_v54 }
 0x4e0   :  { %v1454_v60 = vmul.f32 %v2257_v19, %v1452_v39  ;;  %2260 = vrcp.f32 %v1472_v59  ;;  %vm1459_vm12 = vweird.f32 %v2257_v19  ;;  %v1484_v36 = vand.u32 2147483648, %v1472_v59 }
 0x4e1   :  { %v1597_v2 = vpop.f32.mrf.mxu3  ;;  %vm2876_vm14 = vmor %vm1458_vm13, %vm1459_vm12  ;;  %2262 = vtanh.f32 %v1414_v25  ;;  %v1446_v45 = vor.u32 1.1754944e-38, %v1445_v55  ;;  %vm1444_vm3 = vcmp.eq.f32.partialorder %v1443_v16, 8.507059e+37  ;;  %vm1478_vm5 = vweird.f32 %v1472_v59 }
 0x4e2   :  { %v1455_v8 = vsub.f32 1.0, %v1454_v60  ;;  %v1598_v15 = vadd.f32 %v2872_v18, %v1597_v2  ;;  %v1482_v46 = vand.u32 2147483647, %v1472_v59  ;;  %v1485_v50 = vor.u32 1.1754944e-38, %v1484_v36 }
 0x4e4   :  { %v1456_v20 = vmul.f32 %v2257_v19, %v1455_v8  ;;  %1612 = vst [vmem:[#allocation15] sm:$0xff] %v1598_v15  ;;  %vm1483_vm7 = vcmp.eq.f32.partialorder %v1482_v46, 8.507059e+37 }
 0x4e5   :  { %v2259_v24 = vpop.eup %2258 }
 0x4e6   :  { %v2261_v57 = vpop.eup %2260  ;;  %v1457_v58 = vadd.f32 %v2257_v19, %v1456_v20  ;;  %v1435_v47 = vmul.f32 %v2259_v24, %v1433_v54  ;;  %vm1440_vm15 = vweird.f32 %v2259_v24 }
 0x4e7   :  { %v1474_v3 = vmul.f32 %v2261_v57, %v1472_v59  ;;  %vm1441_vm2 = vmor %vm1439_vm1, %vm1440_vm15  ;;  %v2263_v40 = vpop.eup %2262  ;;  %vm1479_vm4 = vweird.f32 %v2261_v57 }
 0x4e8   :  { %v1436_v4 = vsub.f32 1.0, %v1435_v47  ;;  %v1461_v7 = vsel %vm2876_vm14, %v2257_v19, %v1457_v58  ;;  %vm1480_vm6 = vmor %vm1478_vm5, %vm1479_vm4 }
 0x4e9   :  { %v1599_v27 = vpop.f32.mrf.mxu3  ;;  %v1475_v62 = vsub.f32 1.0, %v1474_v3  ;;  %v1466_v14 = vsel %vm1463_vm0, %v1465_v38, %v1461_v7 }
 0x4ea   :  { %v1437_v33 = vmul.f32 %v2259_v24, %v1436_v4  ;;  %v1600_v37 = vadd.f32 %v2872_v18, %v1599_v27  ;;  %v1488_v51 = vmul.f32 %v1466_v14, %v2863_v42 }
 0x4eb   :  { %v1476_v12 = vmul.f32 %v2261_v57, %v1475_v62 }
 0x4ec   :  { %v1438_v28 = vadd.f32 %v2259_v24, %v1437_v33  ;;  %1613 = vst [vmem:[#allocation15 + $0x8] sm:$0xff] %v1600_v37 }
 0x4ed   :  { %v1477_v21 = vadd.f32 %v2261_v57, %v1476_v12 }
 0x4ee   :  { %v1442_v29 = vsel %vm1441_vm2, %v2259_v24, %v1438_v28 }
 0x4ef   :  { %v1447_v32 = vsel %vm1444_vm3, %v1446_v45, %v1442_v29  ;;  %v1481_v52 = vsel %vm1480_vm6, %v2261_v57, %v1477_v21 }
 0x4f0   :  { %v1489_v53 = vmul.f32 %v2263_v40, %v1447_v32  ;;  %v1486_v1 = vsel %vm1483_vm7, %v1485_v50, %v1481_v52 }
 0x4f1   :  { %v1602_v31 = vpop.f32.mrf.mxu3 }
 0x4f2   :  { %v1490_v63 = vadd.f32 %v1489_v53, %v1488_v51  ;;  %v1603_v10 = vadd.f32 %v2872_v18, %v1602_v31 }
 0x4f4   :  { %2264 = vtanh.f32 %v1490_v63  ;;  %1614 = vst [vmem:[#allocation15 + $0x10] sm:$0xff] %v1603_v10 }
 0x4f9   :  { %v1604_v56 = vpop.f32.mrf.mxu3 }
 0x4fa   :  { %v2265_v61 = vpop.eup %2264  ;;  %v1605_v42 = vadd.f32 %v2872_v18, %v1604_v56 }
 0x4fb   :  { %v1492_v5 = vmul.f32 %v2265_v61, %v1486_v1 }
 0x4fc   :  { %1615 = vst [vmem:[#allocation15 + $0x18] sm:$0xff] %v1605_v42 }
 0x4fd   :  { %v1493_v6 = vpack.c.bf16 %v1492_v5, %v1492_v5 }
 0x4ff   :  { %1495 = vst [vmem:[#allocation2 + $0x14] sm:$0xf] %v1493_v6 }
 0x506   :  { %v2144_v9 = vld [vmem:[#allocation2 + $0x10] sm:$0xff] }
 0x507   :  { %1606 = vmatmul.bf16.gmra.mxu3 %v2144_v9 }
 0x58a   :  { %v1607_v13 = vpop.f32.mrf.mxu3 }
 0x58b   :  { %v1608_v17 = vadd.f32 %v2872_v18, %v1607_v13 }
 0x58d   :  { %1616 = vst [vmem:[#allocation15 + $0x20] sm:$0xff] %v1608_v17 }
 0x592   :  { %v1609_v22 = vpop.f32.mrf.mxu3 }
 0x593   :  { %v1610_v23 = vadd.f32 %v2872_v18, %v1609_v22 }
 0x595   :  { %1617 = vst [vmem:[#allocation15 + $0x28] sm:$0xff] %v1610_v23 }
 0x596   :  { %1630 = dma.vmem_to_hbm [thread:$0]  %s1623_s1, 768, %s1625_s21, [#allocation5], %s2482_s22, %s2482_s22, %s2483_s23  }
 0x597   :  { %2466 = dma.done.wait [#allocation5], 768  }
 0x598   :  { %2467 = vsyncadd [#allocation5], 4294966528 }
 0x599   :  { %1635 = vsyncpa [#allocation4], 1 }
 0x59a   :  { %1636 = vsyncpa [#allocation7], 1 }
 0x59b   :  { %1637 = vsyncpa [#allocation10], 1 }
 0x59c   :  { %1638 = vsyncpa [#allocation13], 1 }
 0x59d   :  { %1639 = vsyncpa [#allocation5], 1 }

</bundles_post_ra>
